<compile_context>
chip_gen: v7x
topology: tpu7x:2x2x1
jax: 0.10.0
libtpu: 0.0.40
codegen_flags: <defaults>
</compile_context>

<pallas_src>
import numpy as np

import jax
import jax.numpy as jnp
from jax.experimental import pallas as pl
from jax.experimental.pallas import tpu as pltpu


# ----------------------------------------------------------------------------
# Fused whole-network kernel (one batch tile of TB images per grid step)
# ----------------------------------------------------------------------------
def _simple_cnn_kernel(x_ref, w1_ref, b1_ref, w2_ref, b2_ref,
                       f1_ref, bf1_ref, f2_ref, bf2_ref, out_ref):
    """Per grid step:
      x_ref  : [1, 32*TB, 128] f32   input slab, row = h*TB + t, lane = w*3+c
      w1_ref : [5, 128, 256]   bf16  conv1 Toeplitz taps (even|odd wo lane halves)
      b1_ref : [1, 128]        f32   conv1 bias tiled over pooled width
      w2_ref : [5, 128, 256]   bf16  conv2 Toeplitz taps
      b2_ref : [1, 128]        f32
      f1_ref : [5, 128, 128]   bf16  fc1 weight, split by pooled row h
      bf1_ref: [1, 128]        f32
      f2_ref : [128, 128]      bf16  fc2 weight (10 classes padded to 128 lanes)
      bf2_ref: [1, 128]        f32
      out_ref: [TB, 128]       f32   sigmoid outputs (lanes >= 10 are padding)
    """
    f32, bf16 = jnp.float32, jnp.bfloat16
    tb = out_ref.shape[0]                       # batch tile size (8)

    # ---- conv1 (5x5, 3->6): 5 Toeplitz taps over ALL raw output rows --------
    # raw output row r, image t  ->  accumulator row r*tb + t
    acc = jnp.zeros((28 * tb, 256), f32)
    for di in range(5):
        lhs = x_ref[0, pl.ds(di * tb, 28 * tb), :].astype(bf16)   # [224, 128]
        acc = acc + jnp.dot(lhs, w1_ref[di], preferred_element_type=f32)
    # maxpool 2x2: height = max of adjacent one-image row blocks, width = lane halves
    m = jnp.concatenate(
        [jnp.maximum(acc[(2 * j) * tb:(2 * j + 1) * tb],
                     acc[(2 * j + 1) * tb:(2 * j + 2) * tb]) for j in range(14)],
        axis=0)                                                   # [112, 256]
    m = jnp.maximum(m[:, :128], m[:, 128:])                       # [112, 128]
    # bias is constant per pooling window -> add after the max
    h1 = jnp.tanh(m + b1_ref[...])          # rows = j*tb + t, lanes = pw1*6 + c1

    # ---- conv2 (5x5, 6->16): same batched-tap trick -------------------------
    acc = jnp.zeros((10 * tb, 256), f32)
    for di in range(5):
        lhs = h1[di * tb: di * tb + 10 * tb].astype(bf16)         # [80, 128]
        acc = acc + jnp.dot(lhs, w2_ref[di], preferred_element_type=f32)
    m = jnp.concatenate(
        [jnp.maximum(acc[(2 * j) * tb:(2 * j + 1) * tb],
                     acc[(2 * j + 1) * tb:(2 * j + 2) * tb]) for j in range(5)],
        axis=0)                                                   # [40, 256]
    m = jnp.maximum(m[:, :128], m[:, 128:])                       # [40, 128]
    h2 = jnp.tanh(m + b2_ref[...])         # rows = j2*tb + t, lanes = pw2*16 + c2

    # ---- fc1 (400 -> 128) + tanh, whole tile at once -------------------------
    # torch.flatten(NCHW) channel-major order is folded into f1_ref's rows.
    acc = jnp.zeros((tb, 128), f32) + bf1_ref[...]
    for h in range(5):
        acc = acc + jnp.dot(h2[h * tb:(h + 1) * tb].astype(bf16), f1_ref[h],
                            preferred_element_type=f32)
    a1 = jnp.tanh(acc)                                            # [TB, 128]

    # ---- fc2 (128 -> 10, padded to 128 lanes) + sigmoid ----------------------
    logits = jnp.dot(a1.astype(bf16), f2_ref[...], preferred_element_type=f32)
    logits = logits + bf2_ref[...]
    out_ref[...] = 1.0 / (1.0 + jnp.exp(-logits))   # exact sigmoid, stays in [0, 1]


# ----------------------------------------------------------------------------
# One-time weight re-layout (runs once, outside the per-call path)
# ----------------------------------------------------------------------------
def _build_conv_toeplitz(w, out_w, rows_pad, cols_pad):
    """Expand a [Cout, Cin, k, k] conv weight into k Toeplitz matrices.

    Returns [k, rows_pad, cols_pad] where, for kernel row di:
      big[di][(wo+dj)*Cin + ci, (wo%2)*(cols_pad//2) + (wo//2)*Cout + co]
        = w[co, ci, di, dj]
    i.e. input rows contract over (width, channel) lanes, and even/odd output
    columns land in the two lane halves so 2x width-pooling is a lane-half max.
    """
    cout, cin, k, _ = w.shape
    half = cols_pad // 2
    di, dj, ci, co, wo = np.meshgrid(
        np.arange(k), np.arange(k), np.arange(cin), np.arange(cout),
        np.arange(out_w), indexing="ij")
    di, dj, ci, co, wo = (a.ravel() for a in (di, dj, ci, co, wo))
    rows = (wo + dj) * cin + ci
    cols = (wo % 2) * half + (wo // 2) * cout + co
    vals = w[co, ci, di, dj]
    big = jnp.zeros((k, rows_pad, cols_pad), jnp.float32)
    return big.at[di, rows, cols].set(vals)


def prepare_params(params):
    """Re-layout the PyTorch-style params into kernel-friendly bf16 slabs."""
    f32, bf16 = jnp.float32, jnp.bfloat16

    w1 = params["conv1_w"].astype(f32)                     # [6, 3, 5, 5]
    w2 = params["conv2_w"].astype(f32)                     # [16, 6, 5, 5]
    big1 = _build_conv_toeplitz(w1, out_w=28, rows_pad=128, cols_pad=256).astype(bf16)
    big2 = _build_conv_toeplitz(w2, out_w=10, rows_pad=128, cols_pad=256).astype(bf16)

    b1 = jnp.zeros((1, 128), f32).at[0, :84].set(jnp.tile(params["conv1_b"].astype(f32), 14))
    b2 = jnp.zeros((1, 128), f32).at[0, :80].set(jnp.tile(params["conv2_b"].astype(f32), 5))

    # fc1: [128, 400] with torch feature order f = c*25 + h*5 + w
    #  -> [h=5, lane = w*16 + c (padded to 128), n=128]
    fw1 = params["fc1_w"].astype(f32).reshape(128, 16, 5, 5)      # [n, c, h, w]
    fw1 = jnp.transpose(fw1, (2, 3, 1, 0)).reshape(5, 80, 128)    # [h, w*16+c, n]
    f1 = jnp.pad(fw1, ((0, 0), (0, 48), (0, 0))).astype(bf16)     # [5, 128, 128]
    bf1 = params["fc1_b"].astype(f32).reshape(1, 128)

    # fc2: [10, 128] -> [128, 128] (classes padded to a full lane tile)
    f2 = jnp.zeros((128, 128), f32).at[:, :10].set(params["fc2_w"].astype(f32).T).astype(bf16)
    bf2 = jnp.zeros((1, 128), f32).at[0, :10].set(params["fc2_b"].astype(f32))

    return {"W1": big1, "b1": b1, "W2": big2, "b2": b2,
            "F1": f1, "bf1": bf1, "F2": f2, "bf2": bf2}


# ----------------------------------------------------------------------------
# Forward wrapper
# ----------------------------------------------------------------------------
def simple_cnn_forward(x_nchw, prep, *, num_classes=10, batch_tile=8):
    """SimpleCNN forward. x_nchw: [B, 3, 32, 32] -> [B, num_classes]."""
    B, C, H, W = x_nchw.shape
    assert (C, H, W) == (3, 32, 32), "SimpleCNN expects 3x32x32 inputs (fc1 = 16*5*5)"
    TB = batch_tile                                   # must be a multiple of 8

    # NCHW -> [B, H, W*C] (lane = w*3 + c), pad lanes to 128 and batch to a
    # multiple of TB, then interleave so each grid tile is a 2-D [H*TB, 128]
    # slab with row = h*TB + t (this makes every conv tap one big matmul).
    x = jnp.transpose(x_nchw, (0, 2, 3, 1)).reshape(B, H, W * C).astype(jnp.float32)
    b_pad = ((B + TB - 1) // TB) * TB
    n_tiles = b_pad // TB
    x = jnp.pad(x, ((0, b_pad - B), (0, 0), (0, 128 - W * C)))        # [b_pad, 32, 128]
    x = x.reshape(n_tiles, TB, H, 128).transpose(0, 2, 1, 3)          # [nt, 32, TB, 128]
    x = x.reshape(n_tiles, H * TB, 128)                               # [nt, 32*TB, 128]

    weight_bytes = sum(int(np.prod(v.shape)) * v.dtype.itemsize for v in prep.values())
    cost = pl.CostEstimate(
        flops=int(n_tiles * 2 * (5 * 28 * TB * 128 * 256 + 5 * 10 * TB * 128 * 256
                                 + 5 * TB * 128 * 128 + TB * 128 * 128)),
        transcendentals=int(n_tiles * (14 * TB + 5 * TB + 2 * TB) * 128),
        bytes_accessed=int(x.size * 4 + weight_bytes + b_pad * 128 * 4),
    )

    out = pl.pallas_call(
        _simple_cnn_kernel,
        out_shape=jax.ShapeDtypeStruct((b_pad, 128), jnp.float32),
        grid_spec=pltpu.PrefetchScalarGridSpec(
            num_scalar_prefetch=0,
            grid=(n_tiles,),
            in_specs=[
                pl.BlockSpec((1, H * TB, 128), lambda i: (i, 0, 0)),   # x tile
                pl.BlockSpec((5, 128, 256), lambda i: (0, 0, 0)),      # W1
                pl.BlockSpec((1, 128), lambda i: (0, 0)),              # b1
                pl.BlockSpec((5, 128, 256), lambda i: (0, 0, 0)),      # W2
                pl.BlockSpec((1, 128), lambda i: (0, 0)),              # b2
                pl.BlockSpec((5, 128, 128), lambda i: (0, 0, 0)),      # F1
                pl.BlockSpec((1, 128), lambda i: (0, 0)),              # bf1
                pl.BlockSpec((128, 128), lambda i: (0, 0)),            # F2
                pl.BlockSpec((1, 128), lambda i: (0, 0)),              # bf2
            ],
            out_specs=pl.BlockSpec((TB, 128), lambda i: (i, 0)),
        ),
        compiler_params=pltpu.CompilerParams(
            dimension_semantics=("parallel",),
        ),
        cost_estimate=cost,
    )(x, prep["W1"], prep["b1"], prep["W2"], prep["b2"],
      prep["F1"], prep["bf1"], prep["F2"], prep["bf2"])

    return out[:B, :num_classes]


# ----------------------------------------------------------------------------
# Pure-JAX reference (matches the PyTorch module) + params
# ----------------------------------------------------------------------------
def reference_forward(x_nchw, params):
    dn = ("NCHW", "OIHW", "NCHW")

    def conv_block(y, w, b):
        y = jax.lax.conv_general_dilated(y, w, (1, 1), "VALID", dimension_numbers=dn)
        y = y + b[None, :, None, None]
        y = jax.lax.reduce_window(y, -jnp.inf, jax.lax.max,
                                  (1, 1, 2, 2), (1, 1, 2, 2), "VALID")
        return jnp.tanh(y)

    y = conv_block(x_nchw.astype(jnp.float32), params["conv1_w"], params["conv1_b"])
    y = conv_block(y, params["conv2_w"], params["conv2_b"])
    y = y.reshape(y.shape[0], -1)                       # torch.flatten(x, 1) on NCHW
    y = jnp.tanh(y @ params["fc1_w"].T + params["fc1_b"])
    return jax.nn.sigmoid(y @ params["fc2_w"].T + params["fc2_b"])


def init_params(key, num_classes=10, input_features=3):
    ks = jax.random.split(key, 8)
    n = jax.random.normal
    return {
        "conv1_w": 0.10 * n(ks[0], (6, input_features, 5, 5), jnp.float32),
        "conv1_b": 0.05 * n(ks[1], (6,), jnp.float32),
        "conv2_w": 0.10 * n(ks[2], (16, 6, 5, 5), jnp.float32),
        "conv2_b": 0.05 * n(ks[3], (16,), jnp.float32),
        "fc1_w":   0.05 * n(ks[4], (128, 16 * 5 * 5), jnp.float32),   # [out, in]
        "fc1_b":   0.05 * n(ks[5], (128,), jnp.float32),
        "fc2_w":   0.05 * n(ks[6], (num_classes, 128), jnp.float32),  # [out, in]
        "fc2_b":   0.05 * n(ks[7], (num_classes,), jnp.float32),
    }


if __name__ == "__main__":
    key = jax.random.PRNGKey(0)
    k_x, k_p = jax.random.split(key)
    # fc1 expects 16*5*5 features => spatial size must be 32x32 (LeNet-style)
    x = jax.random.normal(k_x, (2, 3, 32, 32), jnp.float32)
    params = init_params(k_p)

    prep = prepare_params(params)            # one-time weight re-layout
    fwd = jax.jit(simple_cnn_forward)
    out = jax.block_until_ready(fwd(x, prep))

    assert out.shape == (2, 10), out.shape
    assert bool(jnp.all((out >= 0.0) & (out <= 1.0))), "sigmoid output out of range"

    ref = reference_forward(x, params)
    err = float(jnp.max(jnp.abs(out - ref)))
    assert err < 5e-2, f"mismatch vs f32 reference: max|diff|={err}"

    print("KERNEL_OK")
</pallas_src>

<mosaic_0001>
module attributes {stable_mosaic.version = 11 : i64} {
  func.func @_simple_cnn_kernel(%arg0: i32, %arg1: memref<1x256x128xf32, #tpu.memory_space<vmem>>, %arg2: memref<5x128x256xbf16, #tpu.memory_space<vmem>>, %arg3: memref<1x128xf32, #tpu.memory_space<vmem>>, %arg4: memref<5x128x256xbf16, #tpu.memory_space<vmem>>, %arg5: memref<1x128xf32, #tpu.memory_space<vmem>>, %arg6: memref<5x128x128xbf16, #tpu.memory_space<vmem>>, %arg7: memref<1x128xf32, #tpu.memory_space<vmem>>, %arg8: memref<128x128xbf16, #tpu.memory_space<vmem>>, %arg9: memref<1x128xf32, #tpu.memory_space<vmem>>, %arg10: memref<8x128xf32, #tpu.memory_space<vmem>>) attributes {dimension_semantics = [#tpu.dimension_semantics<parallel>], iteration_bounds = array<i64: 1>, scalar_prefetch = 0 : i64, scratch_operands = 0 : i64, tpu.core_type = #tpu.core_type<tc>, window_params = [{transform_indices = @transform_0, window_bounds = array<i64: 1, 256, 128>}, {pipeline_mode = #tpu.pipeline_mode<synchronous>, transform_indices = @transform_1, window_bounds = array<i64: 5, 128, 256>}, {pipeline_mode = #tpu.pipeline_mode<synchronous>, transform_indices = @transform_2, window_bounds = array<i64: 1, 128>}, {pipeline_mode = #tpu.pipeline_mode<synchronous>, transform_indices = @transform_3, window_bounds = array<i64: 5, 128, 256>}, {pipeline_mode = #tpu.pipeline_mode<synchronous>, transform_indices = @transform_4, window_bounds = array<i64: 1, 128>}, {pipeline_mode = #tpu.pipeline_mode<synchronous>, transform_indices = @transform_5, window_bounds = array<i64: 5, 128, 128>}, {pipeline_mode = #tpu.pipeline_mode<synchronous>, transform_indices = @transform_6, window_bounds = array<i64: 1, 128>}, {pipeline_mode = #tpu.pipeline_mode<synchronous>, transform_indices = @transform_7, window_bounds = array<i64: 128, 128>}, {pipeline_mode = #tpu.pipeline_mode<synchronous>, transform_indices = @transform_8, window_bounds = array<i64: 1, 128>}, {transform_indices = @transform_9, window_bounds = array<i64: 8, 128>}]} {
    %cst = arith.constant 0.000000e+00 : f32
    %0 = vector.broadcast %cst : f32 to vector<224x256xf32>
    %c0 = arith.constant 0 : index
    %c0_0 = arith.constant 0 : index
    %c0_1 = arith.constant 0 : index
    %1 = vector.load %arg1[%c0, %c0_0, %c0_1] : memref<1x256x128xf32, #tpu.memory_space<vmem>>, vector<1x224x128xf32>
    %2 = vector.shape_cast %1 : vector<1x224x128xf32> to vector<224x128xf32>
    %3 = arith.truncf %2 : vector<224x128xf32> to vector<224x128xbf16>
    %c0_2 = arith.constant 0 : index
    %c0_3 = arith.constant 0 : index
    %c0_4 = arith.constant 0 : index
    %4 = vector.load %arg2[%c0_2, %c0_3, %c0_4] : memref<5x128x256xbf16, #tpu.memory_space<vmem>>, vector<1x128x256xbf16>
    %5 = vector.shape_cast %4 : vector<1x128x256xbf16> to vector<128x256xbf16>
    %cst_5 = arith.constant dense<0.000000e+00> : vector<224x256xf32>
    %6 = tpu.matmul %3, %5, %cst_5 {dimension_numbers = #tpu.dot_dimension_numbers<[1], [0], [0], [1], [0, 0, 1, 1], [], []>} : vector<224x128xbf16>, vector<128x256xbf16>, vector<224x256xf32> -> vector<224x256xf32>
    %7 = arith.addf %0, %6 : vector<224x256xf32>
    %c0_6 = arith.constant 0 : index
    %c8 = arith.constant 8 : index
    %c0_7 = arith.constant 0 : index
    %8 = vector.load %arg1[%c0_6, %c8, %c0_7] : memref<1x256x128xf32, #tpu.memory_space<vmem>>, vector<1x224x128xf32>
    %9 = vector.shape_cast %8 : vector<1x224x128xf32> to vector<224x128xf32>
    %10 = arith.truncf %9 : vector<224x128xf32> to vector<224x128xbf16>
    %c1 = arith.constant 1 : index
    %c0_8 = arith.constant 0 : index
    %c0_9 = arith.constant 0 : index
    %11 = vector.load %arg2[%c1, %c0_8, %c0_9] : memref<5x128x256xbf16, #tpu.memory_space<vmem>>, vector<1x128x256xbf16>
    %12 = vector.shape_cast %11 : vector<1x128x256xbf16> to vector<128x256xbf16>
    %cst_10 = arith.constant dense<0.000000e+00> : vector<224x256xf32>
    %13 = tpu.matmul %10, %12, %cst_10 {dimension_numbers = #tpu.dot_dimension_numbers<[1], [0], [0], [1], [0, 0, 1, 1], [], []>} : vector<224x128xbf16>, vector<128x256xbf16>, vector<224x256xf32> -> vector<224x256xf32>
    %14 = arith.addf %7, %13 : vector<224x256xf32>
    %c0_11 = arith.constant 0 : index
    %c16 = arith.constant 16 : index
    %c0_12 = arith.constant 0 : index
    %15 = vector.load %arg1[%c0_11, %c16, %c0_12] : memref<1x256x128xf32, #tpu.memory_space<vmem>>, vector<1x224x128xf32>
    %16 = vector.shape_cast %15 : vector<1x224x128xf32> to vector<224x128xf32>
    %17 = arith.truncf %16 : vector<224x128xf32> to vector<224x128xbf16>
    %c2 = arith.constant 2 : index
    %c0_13 = arith.constant 0 : index
    %c0_14 = arith.constant 0 : index
    %18 = vector.load %arg2[%c2, %c0_13, %c0_14] : memref<5x128x256xbf16, #tpu.memory_space<vmem>>, vector<1x128x256xbf16>
    %19 = vector.shape_cast %18 : vector<1x128x256xbf16> to vector<128x256xbf16>
    %cst_15 = arith.constant dense<0.000000e+00> : vector<224x256xf32>
    %20 = tpu.matmul %17, %19, %cst_15 {dimension_numbers = #tpu.dot_dimension_numbers<[1], [0], [0], [1], [0, 0, 1, 1], [], []>} : vector<224x128xbf16>, vector<128x256xbf16>, vector<224x256xf32> -> vector<224x256xf32>
    %21 = arith.addf %14, %20 : vector<224x256xf32>
    %c0_16 = arith.constant 0 : index
    %c24 = arith.constant 24 : index
    %c0_17 = arith.constant 0 : index
    %22 = vector.load %arg1[%c0_16, %c24, %c0_17] : memref<1x256x128xf32, #tpu.memory_space<vmem>>, vector<1x224x128xf32>
    %23 = vector.shape_cast %22 : vector<1x224x128xf32> to vector<224x128xf32>
    %24 = arith.truncf %23 : vector<224x128xf32> to vector<224x128xbf16>
    %c3 = arith.constant 3 : index
    %c0_18 = arith.constant 0 : index
    %c0_19 = arith.constant 0 : index
    %25 = vector.load %arg2[%c3, %c0_18, %c0_19] : memref<5x128x256xbf16, #tpu.memory_space<vmem>>, vector<1x128x256xbf16>
    %26 = vector.shape_cast %25 : vector<1x128x256xbf16> to vector<128x256xbf16>
    %cst_20 = arith.constant dense<0.000000e+00> : vector<224x256xf32>
    %27 = tpu.matmul %24, %26, %cst_20 {dimension_numbers = #tpu.dot_dimension_numbers<[1], [0], [0], [1], [0, 0, 1, 1], [], []>} : vector<224x128xbf16>, vector<128x256xbf16>, vector<224x256xf32> -> vector<224x256xf32>
    %28 = arith.addf %21, %27 : vector<224x256xf32>
    %c0_21 = arith.constant 0 : index
    %c32 = arith.constant 32 : index
    %c0_22 = arith.constant 0 : index
    %29 = vector.load %arg1[%c0_21, %c32, %c0_22] : memref<1x256x128xf32, #tpu.memory_space<vmem>>, vector<1x224x128xf32>
    %30 = vector.shape_cast %29 : vector<1x224x128xf32> to vector<224x128xf32>
    %31 = arith.truncf %30 : vector<224x128xf32> to vector<224x128xbf16>
    %c4 = arith.constant 4 : index
    %c0_23 = arith.constant 0 : index
    %c0_24 = arith.constant 0 : index
    %32 = vector.load %arg2[%c4, %c0_23, %c0_24] : memref<5x128x256xbf16, #tpu.memory_space<vmem>>, vector<1x128x256xbf16>
    %33 = vector.shape_cast %32 : vector<1x128x256xbf16> to vector<128x256xbf16>
    %cst_25 = arith.constant dense<0.000000e+00> : vector<224x256xf32>
    %34 = tpu.matmul %31, %33, %cst_25 {dimension_numbers = #tpu.dot_dimension_numbers<[1], [0], [0], [1], [0, 0, 1, 1], [], []>} : vector<224x128xbf16>, vector<128x256xbf16>, vector<224x256xf32> -> vector<224x256xf32>
    %35 = arith.addf %28, %34 : vector<224x256xf32>
    %36 = vector.extract_strided_slice %35 {offsets = [0, 0], sizes = [8, 256], strides = [1, 1]} : vector<224x256xf32> to vector<8x256xf32>
    %37 = vector.extract_strided_slice %35 {offsets = [8, 0], sizes = [8, 256], strides = [1, 1]} : vector<224x256xf32> to vector<8x256xf32>
    %38 = arith.maximumf %36, %37 : vector<8x256xf32>
    %39 = vector.extract_strided_slice %35 {offsets = [16, 0], sizes = [8, 256], strides = [1, 1]} : vector<224x256xf32> to vector<8x256xf32>
    %40 = vector.extract_strided_slice %35 {offsets = [24, 0], sizes = [8, 256], strides = [1, 1]} : vector<224x256xf32> to vector<8x256xf32>
    %41 = arith.maximumf %39, %40 : vector<8x256xf32>
    %42 = vector.extract_strided_slice %35 {offsets = [32, 0], sizes = [8, 256], strides = [1, 1]} : vector<224x256xf32> to vector<8x256xf32>
    %43 = vector.extract_strided_slice %35 {offsets = [40, 0], sizes = [8, 256], strides = [1, 1]} : vector<224x256xf32> to vector<8x256xf32>
    %44 = arith.maximumf %42, %43 : vector<8x256xf32>
    %45 = vector.extract_strided_slice %35 {offsets = [48, 0], sizes = [8, 256], strides = [1, 1]} : vector<224x256xf32> to vector<8x256xf32>
    %46 = vector.extract_strided_slice %35 {offsets = [56, 0], sizes = [8, 256], strides = [1, 1]} : vector<224x256xf32> to vector<8x256xf32>
    %47 = arith.maximumf %45, %46 : vector<8x256xf32>
    %48 = vector.extract_strided_slice %35 {offsets = [64, 0], sizes = [8, 256], strides = [1, 1]} : vector<224x256xf32> to vector<8x256xf32>
    %49 = vector.extract_strided_slice %35 {offsets = [72, 0], sizes = [8, 256], strides = [1, 1]} : vector<224x256xf32> to vector<8x256xf32>
    %50 = arith.maximumf %48, %49 : vector<8x256xf32>
    %51 = vector.extract_strided_slice %35 {offsets = [80, 0], sizes = [8, 256], strides = [1, 1]} : vector<224x256xf32> to vector<8x256xf32>
    %52 = vector.extract_strided_slice %35 {offsets = [88, 0], sizes = [8, 256], strides = [1, 1]} : vector<224x256xf32> to vector<8x256xf32>
    %53 = arith.maximumf %51, %52 : vector<8x256xf32>
    %54 = vector.extract_strided_slice %35 {offsets = [96, 0], sizes = [8, 256], strides = [1, 1]} : vector<224x256xf32> to vector<8x256xf32>
    %55 = vector.extract_strided_slice %35 {offsets = [104, 0], sizes = [8, 256], strides = [1, 1]} : vector<224x256xf32> to vector<8x256xf32>
    %56 = arith.maximumf %54, %55 : vector<8x256xf32>
    %57 = vector.extract_strided_slice %35 {offsets = [112, 0], sizes = [8, 256], strides = [1, 1]} : vector<224x256xf32> to vector<8x256xf32>
    %58 = vector.extract_strided_slice %35 {offsets = [120, 0], sizes = [8, 256], strides = [1, 1]} : vector<224x256xf32> to vector<8x256xf32>
    %59 = arith.maximumf %57, %58 : vector<8x256xf32>
    %60 = vector.extract_strided_slice %35 {offsets = [128, 0], sizes = [8, 256], strides = [1, 1]} : vector<224x256xf32> to vector<8x256xf32>
    %61 = vector.extract_strided_slice %35 {offsets = [136, 0], sizes = [8, 256], strides = [1, 1]} : vector<224x256xf32> to vector<8x256xf32>
    %62 = arith.maximumf %60, %61 : vector<8x256xf32>
    %63 = vector.extract_strided_slice %35 {offsets = [144, 0], sizes = [8, 256], strides = [1, 1]} : vector<224x256xf32> to vector<8x256xf32>
    %64 = vector.extract_strided_slice %35 {offsets = [152, 0], sizes = [8, 256], strides = [1, 1]} : vector<224x256xf32> to vector<8x256xf32>
    %65 = arith.maximumf %63, %64 : vector<8x256xf32>
    %66 = vector.extract_strided_slice %35 {offsets = [160, 0], sizes = [8, 256], strides = [1, 1]} : vector<224x256xf32> to vector<8x256xf32>
    %67 = vector.extract_strided_slice %35 {offsets = [168, 0], sizes = [8, 256], strides = [1, 1]} : vector<224x256xf32> to vector<8x256xf32>
    %68 = arith.maximumf %66, %67 : vector<8x256xf32>
    %69 = vector.extract_strided_slice %35 {offsets = [176, 0], sizes = [8, 256], strides = [1, 1]} : vector<224x256xf32> to vector<8x256xf32>
    %70 = vector.extract_strided_slice %35 {offsets = [184, 0], sizes = [8, 256], strides = [1, 1]} : vector<224x256xf32> to vector<8x256xf32>
    %71 = arith.maximumf %69, %70 : vector<8x256xf32>
    %72 = vector.extract_strided_slice %35 {offsets = [192, 0], sizes = [8, 256], strides = [1, 1]} : vector<224x256xf32> to vector<8x256xf32>
    %73 = vector.extract_strided_slice %35 {offsets = [200, 0], sizes = [8, 256], strides = [1, 1]} : vector<224x256xf32> to vector<8x256xf32>
    %74 = arith.maximumf %72, %73 : vector<8x256xf32>
    %75 = vector.extract_strided_slice %35 {offsets = [208, 0], sizes = [8, 256], strides = [1, 1]} : vector<224x256xf32> to vector<8x256xf32>
    %76 = vector.extract_strided_slice %35 {offsets = [216, 0], sizes = [8, 256], strides = [1, 1]} : vector<224x256xf32> to vector<8x256xf32>
    %77 = arith.maximumf %75, %76 : vector<8x256xf32>
    %78 = tpu.concatenate %38, %41, %44, %47, %50, %53, %56, %59, %62, %65, %68, %71, %74, %77 in 0 : vector<8x256xf32>, vector<8x256xf32>, vector<8x256xf32>, vector<8x256xf32>, vector<8x256xf32>, vector<8x256xf32>, vector<8x256xf32>, vector<8x256xf32>, vector<8x256xf32>, vector<8x256xf32>, vector<8x256xf32>, vector<8x256xf32>, vector<8x256xf32>, vector<8x256xf32> -> vector<112x256xf32>
    %79 = vector.extract_strided_slice %78 {offsets = [0, 0], sizes = [112, 128], strides = [1, 1]} : vector<112x256xf32> to vector<112x128xf32>
    %80 = vector.extract_strided_slice %78 {offsets = [0, 128], sizes = [112, 128], strides = [1, 1]} : vector<112x256xf32> to vector<112x128xf32>
    %81 = arith.maximumf %79, %80 : vector<112x128xf32>
    %c0_26 = arith.constant 0 : index
    %c0_27 = arith.constant 0 : index
    %82 = vector.load %arg3[%c0_26, %c0_27] : memref<1x128xf32, #tpu.memory_space<vmem>>, vector<1x128xf32>
    %83 = vector.broadcast %82 : vector<1x128xf32> to vector<112x128xf32>
    %84 = arith.addf %81, %83 : vector<112x128xf32>
    %85 = math.tanh %84 : vector<112x128xf32>
    %cst_28 = arith.constant 0.000000e+00 : f32
    %86 = vector.broadcast %cst_28 : f32 to vector<80x256xf32>
    %87 = vector.extract_strided_slice %85 {offsets = [0, 0], sizes = [80, 128], strides = [1, 1]} : vector<112x128xf32> to vector<80x128xf32>
    %88 = arith.truncf %87 : vector<80x128xf32> to vector<80x128xbf16>
    %c0_29 = arith.constant 0 : index
    %c0_30 = arith.constant 0 : index
    %c0_31 = arith.constant 0 : index
    %89 = vector.load %arg4[%c0_29, %c0_30, %c0_31] : memref<5x128x256xbf16, #tpu.memory_space<vmem>>, vector<1x128x256xbf16>
    %90 = vector.shape_cast %89 : vector<1x128x256xbf16> to vector<128x256xbf16>
    %cst_32 = arith.constant dense<0.000000e+00> : vector<80x256xf32>
    %91 = tpu.matmul %88, %90, %cst_32 {dimension_numbers = #tpu.dot_dimension_numbers<[1], [0], [0], [1], [0, 0, 1, 1], [], []>} : vector<80x128xbf16>, vector<128x256xbf16>, vector<80x256xf32> -> vector<80x256xf32>
    %92 = arith.addf %86, %91 : vector<80x256xf32>
    %93 = vector.extract_strided_slice %85 {offsets = [8, 0], sizes = [80, 128], strides = [1, 1]} : vector<112x128xf32> to vector<80x128xf32>
    %94 = arith.truncf %93 : vector<80x128xf32> to vector<80x128xbf16>
    %c1_33 = arith.constant 1 : index
    %c0_34 = arith.constant 0 : index
    %c0_35 = arith.constant 0 : index
    %95 = vector.load %arg4[%c1_33, %c0_34, %c0_35] : memref<5x128x256xbf16, #tpu.memory_space<vmem>>, vector<1x128x256xbf16>
    %96 = vector.shape_cast %95 : vector<1x128x256xbf16> to vector<128x256xbf16>
    %cst_36 = arith.constant dense<0.000000e+00> : vector<80x256xf32>
    %97 = tpu.matmul %94, %96, %cst_36 {dimension_numbers = #tpu.dot_dimension_numbers<[1], [0], [0], [1], [0, 0, 1, 1], [], []>} : vector<80x128xbf16>, vector<128x256xbf16>, vector<80x256xf32> -> vector<80x256xf32>
    %98 = arith.addf %92, %97 : vector<80x256xf32>
    %99 = vector.extract_strided_slice %85 {offsets = [16, 0], sizes = [80, 128], strides = [1, 1]} : vector<112x128xf32> to vector<80x128xf32>
    %100 = arith.truncf %99 : vector<80x128xf32> to vector<80x128xbf16>
    %c2_37 = arith.constant 2 : index
    %c0_38 = arith.constant 0 : index
    %c0_39 = arith.constant 0 : index
    %101 = vector.load %arg4[%c2_37, %c0_38, %c0_39] : memref<5x128x256xbf16, #tpu.memory_space<vmem>>, vector<1x128x256xbf16>
    %102 = vector.shape_cast %101 : vector<1x128x256xbf16> to vector<128x256xbf16>
    %cst_40 = arith.constant dense<0.000000e+00> : vector<80x256xf32>
    %103 = tpu.matmul %100, %102, %cst_40 {dimension_numbers = #tpu.dot_dimension_numbers<[1], [0], [0], [1], [0, 0, 1, 1], [], []>} : vector<80x128xbf16>, vector<128x256xbf16>, vector<80x256xf32> -> vector<80x256xf32>
    %104 = arith.addf %98, %103 : vector<80x256xf32>
    %105 = vector.extract_strided_slice %85 {offsets = [24, 0], sizes = [80, 128], strides = [1, 1]} : vector<112x128xf32> to vector<80x128xf32>
    %106 = arith.truncf %105 : vector<80x128xf32> to vector<80x128xbf16>
    %c3_41 = arith.constant 3 : index
    %c0_42 = arith.constant 0 : index
    %c0_43 = arith.constant 0 : index
    %107 = vector.load %arg4[%c3_41, %c0_42, %c0_43] : memref<5x128x256xbf16, #tpu.memory_space<vmem>>, vector<1x128x256xbf16>
    %108 = vector.shape_cast %107 : vector<1x128x256xbf16> to vector<128x256xbf16>
    %cst_44 = arith.constant dense<0.000000e+00> : vector<80x256xf32>
    %109 = tpu.matmul %106, %108, %cst_44 {dimension_numbers = #tpu.dot_dimension_numbers<[1], [0], [0], [1], [0, 0, 1, 1], [], []>} : vector<80x128xbf16>, vector<128x256xbf16>, vector<80x256xf32> -> vector<80x256xf32>
    %110 = arith.addf %104, %109 : vector<80x256xf32>
    %111 = vector.extract_strided_slice %85 {offsets = [32, 0], sizes = [80, 128], strides = [1, 1]} : vector<112x128xf32> to vector<80x128xf32>
    %112 = arith.truncf %111 : vector<80x128xf32> to vector<80x128xbf16>
    %c4_45 = arith.constant 4 : index
    %c0_46 = arith.constant 0 : index
    %c0_47 = arith.constant 0 : index
    %113 = vector.load %arg4[%c4_45, %c0_46, %c0_47] : memref<5x128x256xbf16, #tpu.memory_space<vmem>>, vector<1x128x256xbf16>
    %114 = vector.shape_cast %113 : vector<1x128x256xbf16> to vector<128x256xbf16>
    %cst_48 = arith.constant dense<0.000000e+00> : vector<80x256xf32>
    %115 = tpu.matmul %112, %114, %cst_48 {dimension_numbers = #tpu.dot_dimension_numbers<[1], [0], [0], [1], [0, 0, 1, 1], [], []>} : vector<80x128xbf16>, vector<128x256xbf16>, vector<80x256xf32> -> vector<80x256xf32>
    %116 = arith.addf %110, %115 : vector<80x256xf32>
    %117 = vector.extract_strided_slice %116 {offsets = [0, 0], sizes = [8, 256], strides = [1, 1]} : vector<80x256xf32> to vector<8x256xf32>
    %118 = vector.extract_strided_slice %116 {offsets = [8, 0], sizes = [8, 256], strides = [1, 1]} : vector<80x256xf32> to vector<8x256xf32>
    %119 = arith.maximumf %117, %118 : vector<8x256xf32>
    %120 = vector.extract_strided_slice %116 {offsets = [16, 0], sizes = [8, 256], strides = [1, 1]} : vector<80x256xf32> to vector<8x256xf32>
    %121 = vector.extract_strided_slice %116 {offsets = [24, 0], sizes = [8, 256], strides = [1, 1]} : vector<80x256xf32> to vector<8x256xf32>
    %122 = arith.maximumf %120, %121 : vector<8x256xf32>
    %123 = vector.extract_strided_slice %116 {offsets = [32, 0], sizes = [8, 256], strides = [1, 1]} : vector<80x256xf32> to vector<8x256xf32>
    %124 = vector.extract_strided_slice %116 {offsets = [40, 0], sizes = [8, 256], strides = [1, 1]} : vector<80x256xf32> to vector<8x256xf32>
    %125 = arith.maximumf %123, %124 : vector<8x256xf32>
    %126 = vector.extract_strided_slice %116 {offsets = [48, 0], sizes = [8, 256], strides = [1, 1]} : vector<80x256xf32> to vector<8x256xf32>
    %127 = vector.extract_strided_slice %116 {offsets = [56, 0], sizes = [8, 256], strides = [1, 1]} : vector<80x256xf32> to vector<8x256xf32>
    %128 = arith.maximumf %126, %127 : vector<8x256xf32>
    %129 = vector.extract_strided_slice %116 {offsets = [64, 0], sizes = [8, 256], strides = [1, 1]} : vector<80x256xf32> to vector<8x256xf32>
    %130 = vector.extract_strided_slice %116 {offsets = [72, 0], sizes = [8, 256], strides = [1, 1]} : vector<80x256xf32> to vector<8x256xf32>
    %131 = arith.maximumf %129, %130 : vector<8x256xf32>
    %132 = tpu.concatenate %119, %122, %125, %128, %131 in 0 : vector<8x256xf32>, vector<8x256xf32>, vector<8x256xf32>, vector<8x256xf32>, vector<8x256xf32> -> vector<40x256xf32>
    %133 = vector.extract_strided_slice %132 {offsets = [0, 0], sizes = [40, 128], strides = [1, 1]} : vector<40x256xf32> to vector<40x128xf32>
    %134 = vector.extract_strided_slice %132 {offsets = [0, 128], sizes = [40, 128], strides = [1, 1]} : vector<40x256xf32> to vector<40x128xf32>
    %135 = arith.maximumf %133, %134 : vector<40x128xf32>
    %c0_49 = arith.constant 0 : index
    %c0_50 = arith.constant 0 : index
    %136 = vector.load %arg5[%c0_49, %c0_50] : memref<1x128xf32, #tpu.memory_space<vmem>>, vector<1x128xf32>
    %137 = vector.broadcast %136 : vector<1x128xf32> to vector<40x128xf32>
    %138 = arith.addf %135, %137 : vector<40x128xf32>
    %139 = math.tanh %138 : vector<40x128xf32>
    %cst_51 = arith.constant 0.000000e+00 : f32
    %140 = vector.broadcast %cst_51 : f32 to vector<8x128xf32>
    %c0_52 = arith.constant 0 : index
    %c0_53 = arith.constant 0 : index
    %141 = vector.load %arg7[%c0_52, %c0_53] : memref<1x128xf32, #tpu.memory_space<vmem>>, vector<1x128xf32>
    %142 = vector.broadcast %141 : vector<1x128xf32> to vector<8x128xf32>
    %143 = arith.addf %140, %142 : vector<8x128xf32>
    %144 = vector.extract_strided_slice %139 {offsets = [0, 0], sizes = [8, 128], strides = [1, 1]} : vector<40x128xf32> to vector<8x128xf32>
    %145 = arith.truncf %144 : vector<8x128xf32> to vector<8x128xbf16>
    %c0_54 = arith.constant 0 : index
    %c0_55 = arith.constant 0 : index
    %c0_56 = arith.constant 0 : index
    %146 = vector.load %arg6[%c0_54, %c0_55, %c0_56] : memref<5x128x128xbf16, #tpu.memory_space<vmem>>, vector<1x128x128xbf16>
    %147 = vector.shape_cast %146 : vector<1x128x128xbf16> to vector<128x128xbf16>
    %cst_57 = arith.constant dense<0.000000e+00> : vector<8x128xf32>
    %148 = tpu.matmul %145, %147, %cst_57 {dimension_numbers = #tpu.dot_dimension_numbers<[1], [0], [0], [1], [0, 0, 1, 1], [], []>} : vector<8x128xbf16>, vector<128x128xbf16>, vector<8x128xf32> -> vector<8x128xf32>
    %149 = arith.addf %143, %148 : vector<8x128xf32>
    %150 = vector.extract_strided_slice %139 {offsets = [8, 0], sizes = [8, 128], strides = [1, 1]} : vector<40x128xf32> to vector<8x128xf32>
    %151 = arith.truncf %150 : vector<8x128xf32> to vector<8x128xbf16>
    %c1_58 = arith.constant 1 : index
    %c0_59 = arith.constant 0 : index
    %c0_60 = arith.constant 0 : index
    %152 = vector.load %arg6[%c1_58, %c0_59, %c0_60] : memref<5x128x128xbf16, #tpu.memory_space<vmem>>, vector<1x128x128xbf16>
    %153 = vector.shape_cast %152 : vector<1x128x128xbf16> to vector<128x128xbf16>
    %cst_61 = arith.constant dense<0.000000e+00> : vector<8x128xf32>
    %154 = tpu.matmul %151, %153, %cst_61 {dimension_numbers = #tpu.dot_dimension_numbers<[1], [0], [0], [1], [0, 0, 1, 1], [], []>} : vector<8x128xbf16>, vector<128x128xbf16>, vector<8x128xf32> -> vector<8x128xf32>
    %155 = arith.addf %149, %154 : vector<8x128xf32>
    %156 = vector.extract_strided_slice %139 {offsets = [16, 0], sizes = [8, 128], strides = [1, 1]} : vector<40x128xf32> to vector<8x128xf32>
    %157 = arith.truncf %156 : vector<8x128xf32> to vector<8x128xbf16>
    %c2_62 = arith.constant 2 : index
    %c0_63 = arith.constant 0 : index
    %c0_64 = arith.constant 0 : index
    %158 = vector.load %arg6[%c2_62, %c0_63, %c0_64] : memref<5x128x128xbf16, #tpu.memory_space<vmem>>, vector<1x128x128xbf16>
    %159 = vector.shape_cast %158 : vector<1x128x128xbf16> to vector<128x128xbf16>
    %cst_65 = arith.constant dense<0.000000e+00> : vector<8x128xf32>
    %160 = tpu.matmul %157, %159, %cst_65 {dimension_numbers = #tpu.dot_dimension_numbers<[1], [0], [0], [1], [0, 0, 1, 1], [], []>} : vector<8x128xbf16>, vector<128x128xbf16>, vector<8x128xf32> -> vector<8x128xf32>
    %161 = arith.addf %155, %160 : vector<8x128xf32>
    %162 = vector.extract_strided_slice %139 {offsets = [24, 0], sizes = [8, 128], strides = [1, 1]} : vector<40x128xf32> to vector<8x128xf32>
    %163 = arith.truncf %162 : vector<8x128xf32> to vector<8x128xbf16>
    %c3_66 = arith.constant 3 : index
    %c0_67 = arith.constant 0 : index
    %c0_68 = arith.constant 0 : index
    %164 = vector.load %arg6[%c3_66, %c0_67, %c0_68] : memref<5x128x128xbf16, #tpu.memory_space<vmem>>, vector<1x128x128xbf16>
    %165 = vector.shape_cast %164 : vector<1x128x128xbf16> to vector<128x128xbf16>
    %cst_69 = arith.constant dense<0.000000e+00> : vector<8x128xf32>
    %166 = tpu.matmul %163, %165, %cst_69 {dimension_numbers = #tpu.dot_dimension_numbers<[1], [0], [0], [1], [0, 0, 1, 1], [], []>} : vector<8x128xbf16>, vector<128x128xbf16>, vector<8x128xf32> -> vector<8x128xf32>
    %167 = arith.addf %161, %166 : vector<8x128xf32>
    %168 = vector.extract_strided_slice %139 {offsets = [32, 0], sizes = [8, 128], strides = [1, 1]} : vector<40x128xf32> to vector<8x128xf32>
    %169 = arith.truncf %168 : vector<8x128xf32> to vector<8x128xbf16>
    %c4_70 = arith.constant 4 : index
    %c0_71 = arith.constant 0 : index
    %c0_72 = arith.constant 0 : index
    %170 = vector.load %arg6[%c4_70, %c0_71, %c0_72] : memref<5x128x128xbf16, #tpu.memory_space<vmem>>, vector<1x128x128xbf16>
    %171 = vector.shape_cast %170 : vector<1x128x128xbf16> to vector<128x128xbf16>
    %cst_73 = arith.constant dense<0.000000e+00> : vector<8x128xf32>
    %172 = tpu.matmul %169, %171, %cst_73 {dimension_numbers = #tpu.dot_dimension_numbers<[1], [0], [0], [1], [0, 0, 1, 1], [], []>} : vector<8x128xbf16>, vector<128x128xbf16>, vector<8x128xf32> -> vector<8x128xf32>
    %173 = arith.addf %167, %172 : vector<8x128xf32>
    %174 = math.tanh %173 : vector<8x128xf32>
    %175 = arith.truncf %174 : vector<8x128xf32> to vector<8x128xbf16>
    %c0_74 = arith.constant 0 : index
    %c0_75 = arith.constant 0 : index
    %176 = vector.load %arg8[%c0_74, %c0_75] : memref<128x128xbf16, #tpu.memory_space<vmem>>, vector<128x128xbf16>
    %cst_76 = arith.constant dense<0.000000e+00> : vector<8x128xf32>
    %177 = tpu.matmul %175, %176, %cst_76 {dimension_numbers = #tpu.dot_dimension_numbers<[1], [0], [0], [1], [0, 0, 1, 1], [], []>} : vector<8x128xbf16>, vector<128x128xbf16>, vector<8x128xf32> -> vector<8x128xf32>
    %c0_77 = arith.constant 0 : index
    %c0_78 = arith.constant 0 : index
    %178 = vector.load %arg9[%c0_77, %c0_78] : memref<1x128xf32, #tpu.memory_space<vmem>>, vector<1x128xf32>
    %179 = vector.broadcast %178 : vector<1x128xf32> to vector<8x128xf32>
    %180 = arith.addf %177, %179 : vector<8x128xf32>
    %cst_79 = arith.constant 0.000000e+00 : f32
    %181 = vector.broadcast %cst_79 : f32 to vector<8x128xf32>
    %182 = arith.subf %181, %180 : vector<8x128xf32>
    %183 = math.exp %182 : vector<8x128xf32>
    %cst_80 = arith.constant 1.000000e+00 : f32
    %184 = vector.broadcast %cst_80 : f32 to vector<8x128xf32>
    %185 = arith.addf %184, %183 : vector<8x128xf32>
    %cst_81 = arith.constant 1.000000e+00 : f32
    %186 = vector.broadcast %cst_81 : f32 to vector<8x128xf32>
    %187 = arith.divf %186, %185 : vector<8x128xf32>
    %c0_82 = arith.constant 0 : index
    %c0_83 = arith.constant 0 : index
    %188 = vector.load %arg10[%c0_82, %c0_83] : memref<8x128xf32, #tpu.memory_space<vmem>>, vector<8x128xf32>
    tpu.vector_store %arg10[%c0_82, %c0_83], %187 {strides = array<i32>} : memref<8x128xf32, #tpu.memory_space<vmem>>, vector<8x128xf32>,
    return
  }
  func.func @transform_0(%arg0: i32) -> (i32, i32, i32) {
    %c0_i32 = arith.constant 0 : i32
    %c0_i32_0 = arith.constant 0 : i32
    %c0_i32_1 = arith.constant 0 : i32
    return %arg0, %c0_i32, %c0_i32_0 : i32, i32, i32
  }
  func.func @transform_1(%arg0: i32) -> (i32, i32, i32) {
    %c0_i32 = arith.constant 0 : i32
    %c0_i32_0 = arith.constant 0 : i32
    %c0_i32_1 = arith.constant 0 : i32
    %c0_i32_2 = arith.constant 0 : i32
    return %c0_i32, %c0_i32_0, %c0_i32_1 : i32, i32, i32
  }
  func.func @transform_2(%arg0: i32) -> (i32, i32) {
    %c0_i32 = arith.constant 0 : i32
    %c0_i32_0 = arith.constant 0 : i32
    %c0_i32_1 = arith.constant 0 : i32
    return %c0_i32, %c0_i32_0 : i32, i32
  }
  func.func @transform_3(%arg0: i32) -> (i32, i32, i32) {
    %c0_i32 = arith.constant 0 : i32
    %c0_i32_0 = arith.constant 0 : i32
    %c0_i32_1 = arith.constant 0 : i32
    %c0_i32_2 = arith.constant 0 : i32
    return %c0_i32, %c0_i32_0, %c0_i32_1 : i32, i32, i32
  }
  func.func @transform_4(%arg0: i32) -> (i32, i32) {
    %c0_i32 = arith.constant 0 : i32
    %c0_i32_0 = arith.constant 0 : i32
    %c0_i32_1 = arith.constant 0 : i32
    return %c0_i32, %c0_i32_0 : i32, i32
  }
  func.func @transform_5(%arg0: i32) -> (i32, i32, i32) {
    %c0_i32 = arith.constant 0 : i32
    %c0_i32_0 = arith.constant 0 : i32
    %c0_i32_1 = arith.constant 0 : i32
    %c0_i32_2 = arith.constant 0 : i32
    return %c0_i32, %c0_i32_0, %c0_i32_1 : i32, i32, i32
  }
  func.func @transform_6(%arg0: i32) -> (i32, i32) {
    %c0_i32 = arith.constant 0 : i32
    %c0_i32_0 = arith.constant 0 : i32
    %c0_i32_1 = arith.constant 0 : i32
    return %c0_i32, %c0_i32_0 : i32, i32
  }
  func.func @transform_7(%arg0: i32) -> (i32, i32) {
    %c0_i32 = arith.constant 0 : i32
    %c0_i32_0 = arith.constant 0 : i32
    %c0_i32_1 = arith.constant 0 : i32
    return %c0_i32, %c0_i32_0 : i32, i32
  }
  func.func @transform_8(%arg0: i32) -> (i32, i32) {
    %c0_i32 = arith.constant 0 : i32
    %c0_i32_0 = arith.constant 0 : i32
    %c0_i32_1 = arith.constant 0 : i32
    return %c0_i32, %c0_i32_0 : i32, i32
  }
  func.func @transform_9(%arg0: i32) -> (i32, i32) {
    %c0_i32 = arith.constant 0 : i32
    %c0_i32_0 = arith.constant 0 : i32
    return %arg0, %c0_i32 : i32, i32
  }
}

</mosaic_0001>

<bundles_post_ra>
// kernel: simple_cnn_forward.1
= control target key start
LH: loop header
LB: loop body
LE: loop exit
PB: predicated region body
PF: predicated region fallthrough
CT: control target
= control target key end

     0   :  { %v6133_v1 = vmov 0   ;;  %vm4732_vm0 = vmmov 0   ;;  %s6123_s1 = inlined_call_operand.vmem [shape: bf16[5,128,256], index: 1, kind: input, shape index: {}]   ;;  %s6124_s0 = inlined_call_operand.vmem [shape: f32[1,256,128], index: 0, kind: input, shape index: {}]   ;;  %s6125_s3 = inlined_call_operand.vmem [shape: bf16[5,128,256], index: 3, kind: input, shape index: {}]   ;;  %s6126_s2 = inlined_call_operand.vmem [shape: f32[1,128], index: 2, kind: input, shape index: {}]   ;;  %s6127_s5 = inlined_call_operand.vmem [shape: bf16[5,128,128], index: 5, kind: input, shape index: {}]   ;;  %s6128_s4 = inlined_call_operand.vmem [shape: f32[1,128], index: 4, kind: input, shape index: {}]   ;;  %s6129_s7 = inlined_call_operand.vmem [shape: bf16[128,128], index: 7, kind: input, shape index: {}]   ;;  %s6130_s6 = inlined_call_operand.vmem [shape: f32[1,128], index: 6, kind: input, shape index: {}]   ;;  %s6131_s8 = inlined_call_operand.vmem [shape: f32[1,128], index: 8, kind: input, shape index: {}]   ;;  %s6132_s9 = inlined_call_operand.vmem [shape: f32[8,128], index: 9, kind: output, shape index: {}]  }
   0x1   :  { %v4398_v0 = vld [vmem:[%s6123_s1 + $0x84] ss:$8 sps:$4 sm:$0xff]   ;;  %235 = vmatprep.mubr.bf16.mxu0 %v6133_v1  ;;  %1556 = vmatprep.mubr.bf16.mxu1 %v6133_v1  ;;  %v4400_v2 = vld [vmem:[%s6123_s1 + $0x80] ss:$8 sps:$4 sm:$0xff]   ;;  %v4401_v3 = vld [vmem:[%s6123_s1 + $0x94] ss:$8 sps:$4 sm:$0xff]  }
   0x2   :  { %203 = vmatprep.subr.bf16.mxu0 %v4398_v0  ;;  %v4403_v4 = vld [vmem:[%s6123_s1 + $0x90] ss:$8 sps:$4 sm:$0xff]   ;;  %v4404_v5 = vld [vmem:[%s6123_s1 + $0xa4] ss:$8 sps:$4 sm:$0xff]   ;;  %v4406_v6 = vld [vmem:[%s6123_s1 + $0xa0] ss:$8 sps:$4 sm:$0xff]  }
   0x3   :  { %204 = vmatpush1.bf16.msra.mxu0 %v4400_v2  ;;  %v4407_v7 = vld [vmem:[%s6123_s1 + $0xb4] ss:$8 sps:$4 sm:$0xff]   ;;  %v4409_v8 = vld [vmem:[%s6123_s1 + $0xb0] ss:$8 sps:$4 sm:$0xff]   ;;  %v4410_v9 = vld [vmem:[%s6123_s1 + $0xc4] ss:$8 sps:$4 sm:$0xff]  }
   0x4   :  { %205 = vmatprep.subr.bf16.mxu0 %v4401_v3  ;;  %v4412_v10 = vld [vmem:[%s6123_s1 + $0xc0] ss:$8 sps:$4 sm:$0xff]   ;;  %v4413_v11 = vld [vmem:[%s6123_s1 + $0xd4] ss:$8 sps:$4 sm:$0xff]   ;;  %v4415_v14 = vld [vmem:[%s6123_s1 + $0xd0] ss:$8 sps:$4 sm:$0xff]  }
   0x5   :  { %v35_v12 = vld [vmem:[%s6124_s0 + $0x10] sm:$0xff]  ;;  %v36_v13 = vld [vmem:[%s6124_s0 + $0x18] sm:$0xff]  ;;  %v4416_v16 = vld [vmem:[%s6123_s1 + $0xe4] ss:$8 sps:$4 sm:$0xff]  }
   0x6   :  { %v4827_v15 = vpack.c.bf16 %v36_v13, %v35_v12  ;;  %v4418_v17 = vld [vmem:[%s6123_s1 + $0xe0] ss:$8 sps:$4 sm:$0xff]   ;;  %v4419_v18 = vld [vmem:[%s6123_s1 + $0xf4] ss:$8 sps:$4 sm:$0xff]   ;;  %v4421_v21 = vld [vmem:[%s6123_s1 + $0xf0] ss:$8 sps:$4 sm:$0xff]  }
   0x7   :  { %206 = vmatpush1.bf16.msra.mxu0 %v4403_v4  ;;  %v37_v19 = vld [vmem:[%s6124_s0 + $0x20] sm:$0xff]  ;;  %v38_v20 = vld [vmem:[%s6124_s0 + $0x28] sm:$0xff]  ;;  %v4427_v27 = vld [vmem:[%s6123_s1 + $0x14] ss:$8 sps:$4 sm:$0xff]  }
   0x8   :  { %207 = vmatprep.subr.bf16.mxu0 %v4404_v5  ;;  %v4850_v22 = vld [vmem:[%s6124_s0 + $0x8] sm:$0xff]  ;;  %v4852_v23 = vpack.c.bf16 %v38_v20, %v37_v19  ;;  %v4425_v28 = vld [vmem:[%s6123_s1 + $0x10] ss:$8 sps:$4 sm:$0xff]   ;;  %v4882_v34 = vpack.c.bf16 %v37_v19, %v36_v13  ;;  %v4433_v35 = vld [vmem:[%s6123_s1 + $0x34] ss:$8 sps:$4 sm:$0xff]  }
   0x9   :  { %v4424_v24 = vld [vmem:[%s6123_s1 + $0x4] ss:$8 sps:$4 sm:$0xff]   ;;  %v92_v25 = vpack.c.bf16 %v35_v12, %v4850_v22  ;;  %v4422_v26 = vld [vmem:[%s6123_s1] ss:$8 sps:$4 sm:$0xff]   ;;  %v39_v29 = vld [vmem:[%s6124_s0 + $0x30] sm:$0xff] }
   0xa   :  { %v40_v30 = vld [vmem:[%s6124_s0 + $0x38] sm:$0xff]  ;;  %v4430_v31 = vld [vmem:[%s6123_s1 + $0x24] ss:$8 sps:$4 sm:$0xff]   ;;  %v4428_v33 = vld [vmem:[%s6123_s1 + $0x20] ss:$8 sps:$4 sm:$0xff]   ;;  %v4906_v42 = vpack.c.bf16 %v39_v29, %v38_v20 }
   0xb   :  { %208 = vmatpush1.bf16.msra.mxu0 %v4406_v6  ;;  %v4877_v32 = vpack.c.bf16 %v40_v30, %v39_v29  ;;  %v41_v36 = vld [vmem:[%s6124_s0 + $0x40] sm:$0xff]  ;;  %v42_v37 = vld [vmem:[%s6124_s0 + $0x48] sm:$0xff]  ;;  %v4431_v38 = vld [vmem:[%s6123_s1 + $0x30] ss:$8 sps:$4 sm:$0xff]  }
   0xc   :  { %209 = vmatprep.subr.bf16.mxu0 %v4407_v7  ;;  %v4436_v39 = vld [vmem:[%s6123_s1 + $0x44] ss:$8 sps:$4 sm:$0xff]   ;;  %v4901_v40 = vpack.c.bf16 %v42_v37, %v41_v36  ;;  %v4434_v41 = vld [vmem:[%s6123_s1 + $0x40] ss:$8 sps:$4 sm:$0xff]   ;;  %v4439_v43 = vld [vmem:[%s6123_s1 + $0x54] ss:$8 sps:$4 sm:$0xff]   ;;  %v4927_v49 = vpack.c.bf16 %v41_v36, %v40_v30 }
   0xd   :  { %v43_v44 = vld [vmem:[%s6124_s0 + $0x50] sm:$0xff]  ;;  %v44_v45 = vld [vmem:[%s6124_s0 + $0x58] sm:$0xff]  ;;  %v4442_v48 = vld [vmem:[%s6123_s1 + $0x64] ss:$8 sps:$4 sm:$0xff]  }
   0xe   :  { %v4437_v46 = vld [vmem:[%s6123_s1 + $0x50] ss:$8 sps:$4 sm:$0xff]   ;;  %v4922_v47 = vpack.c.bf16 %v44_v45, %v43_v44  ;;  %v4440_v50 = vld [vmem:[%s6123_s1 + $0x60] ss:$8 sps:$4 sm:$0xff]   ;;  %v4445_v51 = vld [vmem:[%s6123_s1 + $0x74] ss:$8 sps:$4 sm:$0xff]   ;;  %v4951_v57 = vpack.c.bf16 %v43_v44, %v42_v37 }
   0xf   :  { %210 = vmatpush1.bf16.msra.mxu0 %v4409_v8  ;;  %v45_v52 = vld [vmem:[%s6124_s0 + $0x60] sm:$0xff]  ;;  %v46_v53 = vld [vmem:[%s6124_s0 + $0x68] sm:$0xff]  ;;  %v4443_v54 = vld [vmem:[%s6123_s1 + $0x70] ss:$8 sps:$4 sm:$0xff]  }
  0x10   :  { %211 = vmatprep.subr.bf16.mxu0 %v4410_v9  ;;  %v4946_v55 = vpack.c.bf16 %v46_v53, %v45_v52  ;;  %v4448_v56 = vld [vmem:[%s6123_s1 + $0x104] ss:$8 sps:$4 sm:$0xff]   ;;  %v47_v58 = vld [vmem:[%s6124_s0 + $0x70] sm:$0xff]  ;;  %v48_v59 = vld [vmem:[%s6124_s0 + $0x78] sm:$0xff]  ;;  %v4963_v61 = vpack.c.bf16 %v45_v52, %v44_v45 }
  0x11   :  { %v4961_v60 = vpack.c.bf16 %v48_v59, %v47_v58  ;;  %v49_v62 = vld [vmem:[%s6124_s0 + $0x80] sm:$0xff]  ;;  %v50_v63 = vld [vmem:[%s6124_s0 + $0x88] sm:$0xff]  ;;  %v4975_v2 = vpack.c.bf16 %v47_v58, %v46_v53  ;;  %v51_v3 = vld [vmem:[%s6124_s0 + $0x90] sm:$0xff] }
  0x12   :  { %v4973_v0 = vpack.c.bf16 %v50_v63, %v49_v62  ;;  %v52_v4 = vld [vmem:[%s6124_s0 + $0x98] sm:$0xff]  ;;  %v4987_v6 = vpack.c.bf16 %v49_v62, %v48_v59  ;;  %v4991_v7 = vpack.c.bf16 %v51_v3, %v50_v63  ;;  %v4998_v8 = vld [vmem:[%s6124_s0 + $0xa0] sm:$0xff] }
  0x13   :  { %212 = vmatpush1.bf16.msra.mxu0 %v4412_v10  ;;  %v4985_v5 = vpack.c.bf16 %v52_v4, %v51_v3  ;;  %v5001_v9 = vpack.c.bf16 %v4998_v8, %v52_v4  ;;  %v5008_v10 = vld [vmem:[%s6124_s0 + $0xa8] sm:$0xff]  ;;  %v5024_v13 = vld [vmem:[%s6124_s0 + $0xb8] sm:$0xff] }
  0x14   :  { %213 = vmatprep.subr.bf16.mxu0 %v4413_v11  ;;  %v5013_v11 = vld [vmem:[%s6124_s0 + $0xb0] sm:$0xff]  ;;  %v5056_v20 = vld [vmem:[%s6124_s0 + $0xd8] sm:$0xff]  ;;  %v4452_v30 = vld [vmem:[%s6123_s1 + $0x120] ss:$8 sps:$4 sm:$0xff]  }
  0x15   :  { %v5017_v12 = vpack.c.bf16 %v5013_v11, %v5008_v10  ;;  %v4449_v29 = vld [vmem:[%s6123_s1 + $0x110] ss:$8 sps:$4 sm:$0xff]   ;;  %v4458_v36 = vld [vmem:[%s6123_s1 + $0x140] ss:$8 sps:$4 sm:$0xff]   ;;  %v4463_v37 = vld [vmem:[%s6123_s1 + $0x154] ss:$8 sps:$4 sm:$0xff]   ;;  %v5171_v53 = vpack.c.bf16 %v5024_v13, %v5013_v11 }
  0x16   :  { %v4467_v44 = vld [vmem:[%s6123_s1 + $0x170] ss:$8 sps:$4 sm:$0xff]   ;;  %v4472_v45 = vld [vmem:[%s6123_s1 + $0x184] ss:$8 sps:$4 sm:$0xff]   ;;  %v5189_v58 = vld [vmem:[%s6123_s1 + $0x234] ss:$8 sps:$4 sm:$0xff]  }
  0x17   :  { %214 = vmatpush1.bf16.msra.mxu0 %v4415_v14  ;;  %v5029_v14 = vld [vmem:[%s6124_s0 + $0xc0] sm:$0xff]  ;;  %v5166_v52 = vld [vmem:[%s6123_s1 + $0x210] ss:$8 sps:$4 sm:$0xff]   ;;  %v5221_v4 = vld [vmem:[%s6123_s1 + $0x254] ss:$8 sps:$4 sm:$0xff]  }
  0x18   :  { %215 = vmatprep.subr.bf16.mxu0 %v4416_v16  ;;  %v5033_v16 = vpack.c.bf16 %v5029_v14, %v5024_v13  ;;  %v5196_v59 = vld [vmem:[%s6123_s1 + $0x230] ss:$8 sps:$4 sm:$0xff]   ;;  %v5207_v63 = vld [vmem:[%s6123_s1 + $0x244] ss:$8 sps:$4 sm:$0xff]   ;;  %v5212_v3 = vld [vmem:[%s6123_s1 + $0x240] ss:$8 sps:$4 sm:$0xff]  }
  0x19   :  { %v5237_v11 = vld [vmem:[%s6123_s1 + $0x264] ss:$8 sps:$4 sm:$0xff]   ;;  %v5242_v13 = vld [vmem:[%s6123_s1 + $0x260] ss:$8 sps:$4 sm:$0xff]  }
  0x1b   :  { %216 = vmatpush1.bf16.msra.mxu0 %v4418_v17  ;;  %v5040_v17 = vld [vmem:[%s6124_s0 + $0xc8] sm:$0xff] }
  0x1c   :  { %217 = vmatprep.subr.bf16.mxu0 %v4419_v18  ;;  %v5045_v18 = vld [vmem:[%s6124_s0 + $0xd0] sm:$0xff]  ;;  %v5201_v62 = vpack.c.bf16 %v5040_v17, %v5029_v14 }
  0x1d   :  { %v5049_v19 = vpack.c.bf16 %v5045_v18, %v5040_v17  ;;  %v5249_v14 = vld [vmem:[%s6123_s1 + $0x274] ss:$8 sps:$4 sm:$0xff]   ;;  %v5256_v17 = vld [vmem:[%s6123_s1 + $0x270] ss:$8 sps:$4 sm:$0xff]  }
  0x1f   :  { %218 = vmatpush1.bf16.msra.mxu0 %v4421_v21  ;;  %v5061_v21 = vld [vmem:[%s6124_s0 + $0xe0] sm:$0xff] }
  0x20   :  { %456 = vmatprep.subr.bf16.mxu0 %v4424_v24  ;;  %v5065_v24 = vpack.c.bf16 %v5061_v21, %v5056_v20 }
  0x22   :  { %236 = vmatmul.mubr.bf16.vlgmr.msra.gmra.mrb[0].mxu0 %v92_v25  ;;  %v33_v25 = vld [vmem:[%s6124_s0] sm:$0xff] }
  0x23   :  { %457 = vmatpush1.bf16.msra.mxu0 %v4422_v26  ;;  %245 = vmatprep.mubr.bf16.mxu0 %v6133_v1  ;;  %v61_v26 = vpack.c.bf16 %v4850_v22, %v33_v25  ;;  %v4454_v22 = vld [vmem:[%s6123_s1 + $0x124] ss:$8 sps:$4 sm:$0xff]   ;;  %v4473_v25 = vld [vmem:[%s6123_s1 + $0x190] ss:$8 sps:$4 sm:$0xff]  }
  0x24   :  { %458 = vmatprep.subr.bf16.mxu0 %v4427_v27  ;;  %v4446_v27 = vld [vmem:[%s6123_s1 + $0x100] ss:$8 sps:$4 sm:$0xff]  }
  0x27   :  { %459 = vmatpush1.bf16.msra.mxu0 %v4425_v28  ;;  %v4451_v28 = vld [vmem:[%s6123_s1 + $0x114] ss:$8 sps:$4 sm:$0xff]  }
  0x28   :  { %460 = vmatprep.subr.bf16.mxu0 %v4430_v31  ;;  %v4457_v31 = vld [vmem:[%s6123_s1 + $0x134] ss:$8 sps:$4 sm:$0xff]  }
  0x2a   :  { %246 = vmatmul.mubr.bf16.gmra.mrb[4].mxu0 %v4882_v34 }
  0x2b   :  { %255 = vmatprep.mubr.bf16.mxu0 %v6133_v1  ;;  %461 = vmatpush1.bf16.msra.mxu0 %v4428_v33  ;;  %v4455_v33 = vld [vmem:[%s6123_s1 + $0x130] ss:$8 sps:$4 sm:$0xff]  }
  0x2c   :  { %462 = vmatprep.subr.bf16.mxu0 %v4433_v35  ;;  %v4460_v35 = vld [vmem:[%s6123_s1 + $0x144] ss:$8 sps:$4 sm:$0xff]  }
  0x2f   :  { %463 = vmatpush1.bf16.msra.mxu0 %v4431_v38  ;;  %v4461_v38 = vld [vmem:[%s6123_s1 + $0x150] ss:$8 sps:$4 sm:$0xff]  }
  0x30   :  { %464 = vmatprep.subr.bf16.mxu0 %v4436_v39  ;;  %v4466_v39 = vld [vmem:[%s6123_s1 + $0x164] ss:$8 sps:$4 sm:$0xff]  }
  0x32   :  { %256 = vmatmul.mubr.bf16.gmra.mrb[8].mxu0 %v4906_v42 }
  0x33   :  { %265 = vmatprep.mubr.bf16.mxu0 %v6133_v1  ;;  %465 = vmatpush1.bf16.msra.mxu0 %v4434_v41  ;;  %v4464_v41 = vld [vmem:[%s6123_s1 + $0x160] ss:$8 sps:$4 sm:$0xff]  }
  0x34   :  { %466 = vmatprep.subr.bf16.mxu0 %v4439_v43  ;;  %v4469_v43 = vld [vmem:[%s6123_s1 + $0x174] ss:$8 sps:$4 sm:$0xff]  }
  0x37   :  { %467 = vmatpush1.bf16.msra.mxu0 %v4437_v46  ;;  %v5142_v46 = vpack.c.bf16 %v5008_v10, %v4998_v8  ;;  %v5226_v8 = vld [vmem:[%s6123_s1 + $0x250] ss:$8 sps:$4 sm:$0xff]   ;;  %v5231_v10 = vpack.c.bf16 %v5056_v20, %v5045_v18  ;;  %v4470_v18 = vld [vmem:[%s6123_s1 + $0x180] ss:$8 sps:$4 sm:$0xff]   ;;  %v4475_v20 = vld [vmem:[%s6123_s1 + $0x194] ss:$8 sps:$4 sm:$0xff]  }
  0x38   :  { %468 = vmatprep.subr.bf16.mxu0 %v4442_v48  ;;  %v5147_v48 = vld [vmem:[%s6123_s1 + $0x204] ss:$8 sps:$4 sm:$0xff]  }
  0x39   :  { %4058 = vmatprep.subr.bf16.mxu1 %v5147_v48 }
  0x3a   :  { %266 = vmatmul.mubr.bf16.gmra.mrb[12].mxu0 %v4927_v49 }
  0x3b   :  { %275 = vmatprep.mubr.bf16.mxu0 %v6133_v1  ;;  %469 = vmatpush1.bf16.msra.mxu0 %v4440_v50  ;;  %v5152_v50 = vld [vmem:[%s6123_s1 + $0x200] ss:$8 sps:$4 sm:$0xff]  }
  0x3c   :  { %470 = vmatprep.subr.bf16.mxu0 %v4445_v51  ;;  %v5159_v51 = vld [vmem:[%s6123_s1 + $0x214] ss:$8 sps:$4 sm:$0xff]   ;;  %4066 = vmatpush1.bf16.msra.mxu1 %v5152_v50 }
  0x3d   :  { %4059 = vmatprep.subr.bf16.mxu1 %v5159_v51 }
  0x3f   :  { %471 = vmatpush1.bf16.msra.mxu0 %v4443_v54  ;;  %v5177_v54 = vld [vmem:[%s6123_s1 + $0x224] ss:$8 sps:$4 sm:$0xff]  }
  0x40   :  { %768 = vmatprep.subr.bf16.mxu0 %v4448_v56  ;;  %4067 = vmatpush1.bf16.msra.mxu1 %v5166_v52  ;;  %v5182_v56 = vld [vmem:[%s6123_s1 + $0x220] ss:$8 sps:$4 sm:$0xff]  }
  0x41   :  { %4060 = vmatprep.subr.bf16.mxu1 %v5177_v54 }
  0x42   :  { %276 = vmatmul.mubr.bf16.gmra.mrb[16].mxu0 %v4951_v57 }
  0x43   :  { %285 = vmatprep.mubr.bf16.mxu0 %v6133_v1 }
  0x44   :  { %4068 = vmatpush1.bf16.msra.mxu1 %v5182_v56 }
  0x45   :  { %4061 = vmatprep.subr.bf16.mxu1 %v5189_v58 }
  0x48   :  { %4069 = vmatpush1.bf16.msra.mxu1 %v5196_v59 }
  0x49   :  { %4062 = vmatprep.subr.bf16.mxu1 %v5207_v63 }
  0x4a   :  { %286 = vmatmul.mubr.bf16.gmra.mrb[20].mxu0 %v4963_v61 }
  0x4b   :  { %295 = vmatprep.mubr.bf16.mxu0 %v6133_v1 }
  0x4c   :  { %4070 = vmatpush1.bf16.msra.mxu1 %v5212_v3 }
  0x4d   :  { %4063 = vmatprep.subr.bf16.mxu1 %v5221_v4 }
  0x50   :  { %4071 = vmatpush1.bf16.msra.mxu1 %v5226_v8 }
  0x51   :  { %4064 = vmatprep.subr.bf16.mxu1 %v5237_v11 }
  0x52   :  { %296 = vmatmul.mubr.bf16.gmra.mrb[24].mxu0 %v4975_v2 }
  0x53   :  { %305 = vmatprep.mubr.bf16.mxu0 %v6133_v1 }
  0x54   :  { %4072 = vmatpush1.bf16.msra.mxu1 %v5242_v13 }
  0x55   :  { %4065 = vmatprep.subr.bf16.mxu1 %v5249_v14 }
  0x58   :  { %4073 = vmatpush1.bf16.msra.mxu1 %v5256_v17 }
  0x5a   :  { %306 = vmatmul.mubr.bf16.gmra.mrb[28].mxu0 %v4987_v6 }
  0x5b   :  { %315 = vmatprep.mubr.bf16.mxu0 %v6133_v1  ;;  %1557 = vmatmul.mubr.bf16.vlgmr.msra.gmra.mrb[0].mxu1 %v4901_v40 }
  0x5c   :  { %1566 = vmatprep.mubr.bf16.mxu1 %v6133_v1 }
  0x62   :  { %316 = vmatmul.mubr.bf16.gmra.mrb[32].mxu0 %v4991_v7 }
  0x63   :  { %325 = vmatprep.mubr.bf16.mxu0 %v6133_v1  ;;  %1567 = vmatmul.mubr.bf16.gmra.mrb[4].mxu1 %v4922_v47 }
  0x64   :  { %1576 = vmatprep.mubr.bf16.mxu1 %v6133_v1 }
  0x6a   :  { %326 = vmatmul.mubr.bf16.gmra.mrb[36].mxu0 %v5001_v9 }
  0x6b   :  { %335 = vmatprep.mubr.bf16.mxu0 %v6133_v1  ;;  %1577 = vmatmul.mubr.bf16.gmra.mrb[8].mxu1 %v4946_v55 }
  0x6c   :  { %1586 = vmatprep.mubr.bf16.mxu1 %v6133_v1 }
  0x72   :  { %336 = vmatmul.mubr.bf16.gmra.mrb[40].mxu0 %v5017_v12 }
  0x73   :  { %345 = vmatprep.mubr.bf16.mxu0 %v6133_v1  ;;  %1587 = vmatmul.mubr.bf16.gmra.mrb[12].mxu1 %v4961_v60 }
  0x74   :  { %1596 = vmatprep.mubr.bf16.mxu1 %v6133_v1 }
  0x7a   :  { %346 = vmatmul.mubr.bf16.gmra.mrb[44].mxu0 %v5033_v16 }
  0x7b   :  { %355 = vmatprep.mubr.bf16.mxu0 %v6133_v1  ;;  %1597 = vmatmul.mubr.bf16.gmra.mrb[16].mxu1 %v4973_v0 }
  0x7c   :  { %1606 = vmatprep.mubr.bf16.mxu1 %v6133_v1 }
  0x82   :  { %356 = vmatmul.mubr.bf16.gmra.mrb[48].mxu0 %v5049_v19 }
  0x83   :  { %365 = vmatprep.mubr.bf16.mxu0 %v6133_v1  ;;  %1607 = vmatmul.mubr.bf16.gmra.mrb[20].mxu1 %v4985_v5 }
  0x84   :  { %1616 = vmatprep.mubr.bf16.mxu1 %v6133_v1 }
  0x8a   :  { %366 = vmatmul.mubr.bf16.gmra.mrb[52].mxu0 %v5065_v24 }
  0x8b   :  { %488 = vmatprep.mubr.bf16.mxu0 %v6133_v1  ;;  %1617 = vmatmul.mubr.bf16.gmra.mrb[24].mxu1 %v5142_v46 }
  0x8c   :  { %1626 = vmatprep.mubr.bf16.mxu1 %v6133_v1 }
  0x92   :  { %489 = vmatmul.mubr.bf16.vlgmr.msra.gmra.mrb[0].mxu0 %v61_v26  ;;  %v4478_v26 = vld [vmem:[%s6123_s1 + $0x1a4] ss:$8 sps:$4 sm:$0xff]  }
  0x93   :  { %769 = vmatpush1.bf16.msra.mxu0 %v4446_v27  ;;  %498 = vmatprep.mubr.bf16.mxu0 %v6133_v1  ;;  %v4481_v27 = vld [vmem:[%s6123_s1 + $0x1b4] ss:$8 sps:$4 sm:$0xff]  }
  0x94   :  { %770 = vmatprep.subr.bf16.mxu0 %v4451_v28  ;;  %v4479_v28 = vld [vmem:[%s6123_s1 + $0x1b0] ss:$8 sps:$4 sm:$0xff]   ;;  %1627 = vmatmul.mubr.bf16.gmra.mrb[28].mxu1 %v5171_v53 }
  0x95   :  { %1636 = vmatprep.mubr.bf16.mxu1 %v6133_v1 }
  0x97   :  { %771 = vmatpush1.bf16.msra.mxu0 %v4449_v29  ;;  %v4484_v29 = vld [vmem:[%s6123_s1 + $0x1c4] ss:$8 sps:$4 sm:$0xff]  }
  0x98   :  { %772 = vmatprep.subr.bf16.mxu0 %v4454_v22  ;;  %v4482_v22 = vld [vmem:[%s6123_s1 + $0x1c0] ss:$8 sps:$4 sm:$0xff]  }
  0x9a   :  { %499 = vmatmul.mubr.bf16.gmra.mrb[4].mxu0 %v4827_v15 }
  0x9b   :  { %508 = vmatprep.mubr.bf16.mxu0 %v6133_v1  ;;  %773 = vmatpush1.bf16.msra.mxu0 %v4452_v30  ;;  %v4487_v30 = vld [vmem:[%s6123_s1 + $0x1d4] ss:$8 sps:$4 sm:$0xff]  }
  0x9c   :  { %774 = vmatprep.subr.bf16.mxu0 %v4457_v31  ;;  %v4485_v31 = vld [vmem:[%s6123_s1 + $0x1d0] ss:$8 sps:$4 sm:$0xff]   ;;  %1637 = vmatmul.mubr.bf16.gmra.mrb[32].mxu1 %v5201_v62 }
  0x9d   :  { %1646 = vmatprep.mubr.bf16.mxu1 %v6133_v1 }
  0x9f   :  { %775 = vmatpush1.bf16.msra.mxu0 %v4455_v33  ;;  %v4490_v33 = vld [vmem:[%s6123_s1 + $0x1e4] ss:$8 sps:$4 sm:$0xff]  }
  0xa0   :  { %776 = vmatprep.subr.bf16.mxu0 %v4460_v35  ;;  %v4488_v35 = vld [vmem:[%s6123_s1 + $0x1e0] ss:$8 sps:$4 sm:$0xff]  }
  0xa2   :  { %509 = vmatmul.mubr.bf16.gmra.mrb[8].mxu0 %v4852_v23 }
  0xa3   :  { %518 = vmatprep.mubr.bf16.mxu0 %v6133_v1  ;;  %777 = vmatpush1.bf16.msra.mxu0 %v4458_v36  ;;  %v4496_v36 = vld [vmem:[%s6123_s1 + $0x1f4] ss:$8 sps:$4 sm:$0xff]  }
  0xa4   :  { %778 = vmatprep.subr.bf16.mxu0 %v4463_v37  ;;  %v4494_v37 = vld [vmem:[%s6123_s1 + $0x1f0] ss:$8 sps:$4 sm:$0xff]   ;;  %1647 = vmatmul.mubr.bf16.gmra.mrb[36].mxu1 %v5231_v10 }
  0xa5   :  { %1656 = vmatprep.mubr.bf16.mxu1 %v6133_v1 }
  0xa7   :  { %779 = vmatpush1.bf16.msra.mxu0 %v4461_v38 }
  0xa8   :  { %780 = vmatprep.subr.bf16.mxu0 %v4466_v39 }
  0xaa   :  { %519 = vmatmul.mubr.bf16.gmra.mrb[12].mxu0 %v4877_v32 }
  0xab   :  { %528 = vmatprep.mubr.bf16.mxu0 %v6133_v1  ;;  %781 = vmatpush1.bf16.msra.mxu0 %v4464_v41 }
  0xac   :  { %782 = vmatprep.subr.bf16.mxu0 %v4469_v43 }
  0xaf   :  { %783 = vmatpush1.bf16.msra.mxu0 %v4467_v44 }
  0xb0   :  { %1136 = vmatprep.subr.bf16.mxu0 %v4472_v45  ;;  %v4520_v45 = vld [vmem:[%s6125_s3 + $0x84] ss:$8 sps:$4 sm:$0xff]  }
  0xb1   :  { %1933 = vmatprep.subr.bf16.mxu1 %v4520_v45  ;;  %v4544_v45 = vld [vmem:[%s6125_s3 + $0x4] ss:$8 sps:$4 sm:$0xff]  }
  0xb2   :  { %529 = vmatmul.mubr.bf16.gmra.mrb[16].mxu0 %v4901_v40 }
  0xb3   :  { %538 = vmatprep.mubr.bf16.mxu0 %v6133_v1 }
  0xba   :  { %539 = vmatmul.mubr.bf16.gmra.mrb[20].mxu0 %v4922_v47 }
  0xbb   :  { %548 = vmatprep.mubr.bf16.mxu0 %v6133_v1 }
  0xc2   :  { %549 = vmatmul.mubr.bf16.gmra.mrb[24].mxu0 %v4946_v55 }
  0xc3   :  { %558 = vmatprep.mubr.bf16.mxu0 %v6133_v1 }
  0xca   :  { %559 = vmatmul.mubr.bf16.gmra.mrb[28].mxu0 %v4961_v60 }
  0xcb   :  { %568 = vmatprep.mubr.bf16.mxu0 %v6133_v1 }
  0xd2   :  { %569 = vmatmul.mubr.bf16.gmra.mrb[32].mxu0 %v4973_v0 }
  0xd3   :  { %578 = vmatprep.mubr.bf16.mxu0 %v6133_v1 }
  0xda   :  { %579 = vmatmul.mubr.bf16.gmra.mrb[36].mxu0 %v4985_v5 }
  0xdb   :  { %588 = vmatprep.mubr.bf16.mxu0 %v6133_v1 }
  0xe2   :  { %589 = vmatmul.mubr.bf16.gmra.mrb[40].mxu0 %v5142_v46 }
  0xe3   :  { %598 = vmatprep.mubr.bf16.mxu0 %v6133_v1 }
  0xea   :  { %599 = vmatmul.mubr.bf16.gmra.mrb[44].mxu0 %v5171_v53 }
  0xeb   :  { %608 = vmatprep.mubr.bf16.mxu0 %v6133_v1 }
  0xf2   :  { %609 = vmatmul.mubr.bf16.gmra.mrb[48].mxu0 %v5201_v62 }
  0xf3   :  { %618 = vmatprep.mubr.bf16.mxu0 %v6133_v1 }
  0xfa   :  { %619 = vmatmul.mubr.bf16.gmra.mrb[52].mxu0 %v5231_v10 }
  0xfb   :  { %800 = vmatprep.mubr.bf16.mxu0 %v6133_v1 }
 0x102   :  { %801 = vmatmul.mubr.bf16.vlgmr.msra.gmra.mrb[0].mxu0 %v4827_v15  ;;  %v4476_v15 = vld [vmem:[%s6123_s1 + $0x1a0] ss:$8 sps:$4 sm:$0xff]  }
 0x103   :  { %1137 = vmatpush1.bf16.msra.mxu0 %v4470_v18  ;;  %810 = vmatprep.mubr.bf16.mxu0 %v6133_v1 }
 0x104   :  { %1138 = vmatprep.subr.bf16.mxu0 %v4475_v20 }
 0x107   :  { %1139 = vmatpush1.bf16.msra.mxu0 %v4473_v25 }
 0x108   :  { %1140 = vmatprep.subr.bf16.mxu0 %v4478_v26 }
 0x10a   :  { %811 = vmatmul.mubr.bf16.gmra.mrb[4].mxu0 %v4852_v23 }
 0x10b   :  { %820 = vmatprep.mubr.bf16.mxu0 %v6133_v1  ;;  %1141 = vmatpush1.bf16.msra.mxu0 %v4476_v15  ;;  %v4527_v15 = vld [vmem:[%s6125_s3 + $0xb0] ss:$8 sps:$4 sm:$0xff]  }
 0x10c   :  { %1142 = vmatprep.subr.bf16.mxu0 %v4481_v27  ;;  %v4529_v27 = vld [vmem:[%s6125_s3 + $0xb4] ss:$8 sps:$4 sm:$0xff]  }
 0x10f   :  { %1143 = vmatpush1.bf16.msra.mxu0 %v4479_v28 }
 0x110   :  { %1144 = vmatprep.subr.bf16.mxu0 %v4484_v29 }
 0x112   :  { %821 = vmatmul.mubr.bf16.gmra.mrb[8].mxu0 %v4877_v32 }
 0x113   :  { %830 = vmatprep.mubr.bf16.mxu0 %v6133_v1  ;;  %1145 = vmatpush1.bf16.msra.mxu0 %v4482_v22 }
 0x114   :  { %1146 = vmatprep.subr.bf16.mxu0 %v4487_v30 }
 0x117   :  { %1147 = vmatpush1.bf16.msra.mxu0 %v4485_v31  ;;  %v4530_v31 = vld [vmem:[%s6125_s3 + $0xc0] ss:$8 sps:$4 sm:$0xff]  }
 0x118   :  { %1148 = vmatprep.subr.bf16.mxu0 %v4490_v33  ;;  %v4532_v33 = vld [vmem:[%s6125_s3 + $0xc4] ss:$8 sps:$4 sm:$0xff]  }
 0x11a   :  { %831 = vmatmul.mubr.bf16.gmra.mrb[12].mxu0 %v4901_v40  ;;  %v5349_v40 = vld [vmem:[%s6124_s0 + $0xe8] sm:$0xff] }
 0x11b   :  { %840 = vmatprep.mubr.bf16.mxu0 %v6133_v1  ;;  %1149 = vmatpush1.bf16.msra.mxu0 %v4488_v35 }
 0x11c   :  { %1150 = vmatprep.subr.bf16.mxu0 %v4496_v36 }
 0x11f   :  { %1151 = vmatpush1.bf16.msra.mxu0 %v4494_v37 }
 0x120   :  { %1504 = vmatprep.subr.bf16.mxu0 %v5147_v48 }
 0x122   :  { %841 = vmatmul.mubr.bf16.gmra.mrb[16].mxu0 %v4922_v47  ;;  %v670_v47 = vpack.c.bf16 %v5349_v40, %v5061_v21 }
 0x123   :  { %850 = vmatprep.mubr.bf16.mxu0 %v6133_v1 }
 0x124   :  { %1657 = vmatmul.mubr.bf16.gmra.mrb[40].mxu1 %v670_v47 }
 0x125   :  { %1666 = vmatprep.mubr.bf16.mxu1 %v6133_v1 }
 0x12a   :  { %851 = vmatmul.mubr.bf16.gmra.mrb[20].mxu0 %v4946_v55  ;;  %v1024_v55 = vld [vmem:[%s6124_s0 + $0xf0] sm:$0xff] }
 0x12b   :  { %860 = vmatprep.mubr.bf16.mxu0 %v6133_v1 }
 0x132   :  { %861 = vmatmul.mubr.bf16.gmra.mrb[24].mxu0 %v4961_v60  ;;  %v1392_v60 = vld [vmem:[%s6124_s0 + $0xf8] sm:$0xff] }
 0x133   :  { %870 = vmatprep.mubr.bf16.mxu0 %v6133_v1 }
 0x13a   :  { %871 = vmatmul.mubr.bf16.gmra.mrb[28].mxu0 %v4973_v0  ;;  %v1406_v0 = vpack.c.bf16 %v1392_v60, %v1024_v55  ;;  %v4536_v60 = vld [vmem:[%s6125_s3 + $0xe0] ss:$8 sps:$4 sm:$0xff]  }
 0x13b   :  { %880 = vmatprep.mubr.bf16.mxu0 %v6133_v1 }
 0x13c   :  { %1667 = vmatmul.mubr.bf16.gmra.mrb[44].mxu1 %v1406_v0  ;;  %v4538_v0 = vld [vmem:[%s6125_s3 + $0xe4] ss:$8 sps:$4 sm:$0xff]  }
 0x13d   :  { %1965 = vmatprep.mubr.bf16.mxu1 %v6133_v1 }
 0x142   :  { %881 = vmatmul.mubr.bf16.gmra.mrb[32].mxu0 %v4985_v5 }
 0x143   :  { %890 = vmatprep.mubr.bf16.mxu0 %v6133_v1 }
 0x14a   :  { %891 = vmatmul.mubr.bf16.gmra.mrb[36].mxu0 %v5142_v46 }
 0x14b   :  { %900 = vmatprep.mubr.bf16.mxu0 %v6133_v1 }
 0x152   :  { %901 = vmatmul.mubr.bf16.gmra.mrb[40].mxu0 %v5171_v53 }
 0x153   :  { %910 = vmatprep.mubr.bf16.mxu0 %v6133_v1 }
 0x15a   :  { %911 = vmatmul.mubr.bf16.gmra.mrb[44].mxu0 %v5201_v62 }
 0x15b   :  { %920 = vmatprep.mubr.bf16.mxu0 %v6133_v1 }
 0x162   :  { %921 = vmatmul.mubr.bf16.gmra.mrb[48].mxu0 %v5231_v10  ;;  %v4526_v10 = vld [vmem:[%s6125_s3 + $0xa4] ss:$8 sps:$4 sm:$0xff]  }
 0x163   :  { %930 = vmatprep.mubr.bf16.mxu0 %v6133_v1 }
 0x16a   :  { %931 = vmatmul.mubr.bf16.gmra.mrb[52].mxu0 %v670_v47  ;;  %v4533_v47 = vld [vmem:[%s6125_s3 + $0xd0] ss:$8 sps:$4 sm:$0xff]  }
 0x16b   :  { %1168 = vmatprep.mubr.bf16.mxu0 %v6133_v1 }
 0x172   :  { %1169 = vmatmul.mubr.bf16.vlgmr.msra.gmra.mrb[0].mxu0 %v4882_v34  ;;  %v5409_v34 = vpop.f32.mrb[0].mxu1 }
 0x173   :  { %1505 = vmatpush1.bf16.msra.mxu0 %v5152_v50  ;;  %1178 = vmatprep.mubr.bf16.mxu0 %v6133_v1 }
 0x174   :  { %1506 = vmatprep.subr.bf16.mxu0 %v5159_v51 }
 0x177   :  { %1507 = vmatpush1.bf16.msra.mxu0 %v5166_v52 }
 0x178   :  { %1508 = vmatprep.subr.bf16.mxu0 %v5177_v54 }
 0x17a   :  { %1179 = vmatmul.mubr.bf16.gmra.mrb[4].mxu0 %v4906_v42  ;;  %v1038_v42 = vpack.c.bf16 %v1024_v55, %v5349_v40  ;;  %v4535_v55 = vld [vmem:[%s6125_s3 + $0xd4] ss:$8 sps:$4 sm:$0xff]  }
 0x17b   :  { %1188 = vmatprep.mubr.bf16.mxu0 %v6133_v1  ;;  %1509 = vmatpush1.bf16.msra.mxu0 %v5182_v56 }
 0x17c   :  { %1510 = vmatprep.subr.bf16.mxu0 %v5189_v58  ;;  %v4521_v58 = vld [vmem:[%s6125_s3 + $0x90] ss:$8 sps:$4 sm:$0xff]  }
 0x17f   :  { %1511 = vmatpush1.bf16.msra.mxu0 %v5196_v59  ;;  %v4523_v59 = vld [vmem:[%s6125_s3 + $0x94] ss:$8 sps:$4 sm:$0xff]  }
 0x180   :  { %1512 = vmatprep.subr.bf16.mxu0 %v5207_v63 }
 0x182   :  { %1189 = vmatmul.mubr.bf16.gmra.mrb[8].mxu0 %v4927_v49  ;;  %v5412_v49 = vpop.f32.mrb[1].mxu1 }
 0x183   :  { %1198 = vmatprep.mubr.bf16.mxu0 %v6133_v1  ;;  %1513 = vmatpush1.bf16.msra.mxu0 %v5212_v3 }
 0x184   :  { %1514 = vmatprep.subr.bf16.mxu0 %v5221_v4 }
 0x187   :  { %1515 = vmatpush1.bf16.msra.mxu0 %v5226_v8  ;;  %v4524_v8 = vld [vmem:[%s6125_s3 + $0xa0] ss:$8 sps:$4 sm:$0xff]  }
 0x188   :  { %1516 = vmatprep.subr.bf16.mxu0 %v5237_v11 }
 0x18a   :  { %1199 = vmatmul.mubr.bf16.gmra.mrb[12].mxu0 %v4951_v57  ;;  %v5414_v57 = vpop.f32.mrb[2].mxu1 }
 0x18b   :  { %1208 = vmatprep.mubr.bf16.mxu0 %v6133_v1  ;;  %1517 = vmatpush1.bf16.msra.mxu0 %v5242_v13 }
 0x18c   :  { %1518 = vmatprep.subr.bf16.mxu0 %v5249_v14 }
 0x18f   :  { %1519 = vmatpush1.bf16.msra.mxu0 %v5256_v17 }
 0x192   :  { %1209 = vmatmul.mubr.bf16.gmra.mrb[16].mxu0 %v4963_v61  ;;  %v5416_v61 = vpop.f32.mrb[3].mxu1 }
 0x193   :  { %1218 = vmatprep.mubr.bf16.mxu0 %v6133_v1 }
 0x19a   :  { %1219 = vmatmul.mubr.bf16.gmra.mrb[20].mxu0 %v4975_v2  ;;  %v5419_v2 = vpop.f32.mrb[4].mxu1 }
 0x19b   :  { %1228 = vmatprep.mubr.bf16.mxu0 %v6133_v1  ;;  %v5421_v5 = vpop.f32.mrb[5].mxu1 }
 0x1a2   :  { %1229 = vmatmul.mubr.bf16.gmra.mrb[24].mxu0 %v4987_v6  ;;  %v5423_v6 = vpop.f32.mrb[6].mxu1 }
 0x1a3   :  { %1238 = vmatprep.mubr.bf16.mxu0 %v6133_v1 }
 0x1aa   :  { %1239 = vmatmul.mubr.bf16.gmra.mrb[28].mxu0 %v4991_v7  ;;  %v5425_v7 = vpop.f32.mrb[7].mxu1 }
 0x1ab   :  { %1248 = vmatprep.mubr.bf16.mxu0 %v6133_v1 }
 0x1b2   :  { %1249 = vmatmul.mubr.bf16.gmra.mrb[32].mxu0 %v5001_v9  ;;  %v5429_v9 = vpop.f32.mrb[8].mxu1 }
 0x1b3   :  { %1258 = vmatprep.mubr.bf16.mxu0 %v6133_v1 }
 0x1ba   :  { %1259 = vmatmul.mubr.bf16.gmra.mrb[36].mxu0 %v5017_v12  ;;  %v5431_v12 = vpop.f32.mrb[9].mxu1 }
 0x1bb   :  { %1268 = vmatprep.mubr.bf16.mxu0 %v6133_v1 }
 0x1c2   :  { %1269 = vmatmul.mubr.bf16.gmra.mrb[40].mxu0 %v5033_v16  ;;  %v5433_v16 = vpop.f32.mrb[10].mxu1 }
 0x1c3   :  { %1278 = vmatprep.mubr.bf16.mxu0 %v6133_v1 }
 0x1ca   :  { %1279 = vmatmul.mubr.bf16.gmra.mrb[44].mxu0 %v5049_v19  ;;  %v5435_v19 = vpop.f32.mrb[11].mxu1 }
 0x1cb   :  { %1288 = vmatprep.mubr.bf16.mxu0 %v6133_v1  ;;  %v5438_v21 = vpop.f32.mrb[12].mxu1 }
 0x1d2   :  { %1289 = vmatmul.mubr.bf16.gmra.mrb[48].mxu0 %v5065_v24  ;;  %v5440_v24 = vpop.f32.mrb[13].mxu1 }
 0x1d3   :  { %1298 = vmatprep.mubr.bf16.mxu0 %v6133_v1  ;;  %v5442_v38 = vpop.f32.mrb[14].mxu1 }
 0x1d4   :  { %v5444_v39 = vpop.f32.mrb[15].mxu1 }
 0x1da   :  { %1299 = vmatmul.mubr.bf16.gmra.mrb[52].mxu0 %v1038_v42  ;;  %v4539_v42 = vld [vmem:[%s6125_s3 + $0xf0] ss:$8 sps:$4 sm:$0xff]  }
 0x1db   :  { %1536 = vmatprep.mubr.bf16.mxu0 %v6133_v1 }
 0x1e2   :  { %1537 = vmatmul.mubr.bf16.vlgmr.msra.gmra.mrb[0].mxu0 %v4852_v23  ;;  %v5446_v23 = vpop.f32.mrb[16].mxu1 }
 0x1e3   :  { %1546 = vmatprep.mubr.bf16.mxu0 %v6133_v1  ;;  %v5448_v41 = vpop.f32.mrb[17].mxu1 }
 0x1e4   :  { %v5450_v43 = vpop.f32.mrb[18].mxu1 }
 0x1e5   :  { %v5452_v44 = vpop.f32.mrb[19].mxu1 }
 0x1e6   :  { %v5460_v46 = vpop.f32.mrb[20].mxu1 }
 0x1e7   :  { %v5462_v48 = vpop.f32.mrb[21].mxu1 }
 0x1e8   :  { %v5464_v50 = vpop.f32.mrb[22].mxu1 }
 0x1e9   :  { %v5466_v51 = vpop.f32.mrb[23].mxu1 }
 0x1ea   :  { %1547 = vmatmul.mubr.bf16.gmra.mrb[4].mxu0 %v4877_v32  ;;  %v4518_v32 = vld [vmem:[%s6125_s3 + $0x80] ss:$8 sps:$4 sm:$0xff]   ;;  %v5468_v52 = vpop.f32.mrb[24].mxu1 }
 0x1eb   :  { %1934 = vmatpush1.bf16.msra.mxu1 %v4518_v32  ;;  %v5470_v53 = vpop.f32.mrb[25].mxu1  ;;  %v4541_v32 = vld [vmem:[%s6125_s3 + $0xf4] ss:$8 sps:$4 sm:$0xff]  }
 0x1ec   :  { %v5472_v54 = vpop.f32.mrb[26].mxu1  ;;  %1935 = vmatprep.subr.bf16.mxu1 %v4523_v59 }
 0x1ed   :  { %v5474_v56 = vpop.f32.mrb[27].mxu1 }
 0x1ee   :  { %v5482_v62 = vpop.f32.mrb[28].mxu1 }
 0x1ef   :  { %1936 = vmatpush1.bf16.msra.mxu1 %v4521_v58  ;;  %v5484_v63 = vpop.f32.mrb[29].mxu1 }
 0x1f0   :  { %v5486_v3 = vpop.f32.mrb[30].mxu1  ;;  %1937 = vmatprep.subr.bf16.mxu1 %v4526_v10 }
 0x1f1   :  { %v5488_v4 = vpop.f32.mrb[31].mxu1 }
 0x1f2   :  { %v5496_v11 = vpop.f32.mrb[32].mxu1 }
 0x1f3   :  { %1938 = vmatpush1.bf16.msra.mxu1 %v4524_v8  ;;  %v5498_v13 = vpop.f32.mrb[33].mxu1 }
 0x1f4   :  { %v5500_v14 = vpop.f32.mrb[34].mxu1  ;;  %1939 = vmatprep.subr.bf16.mxu1 %v4529_v27 }
 0x1f5   :  { %v5502_v17 = vpop.f32.mrb[35].mxu1 }
 0x1f6   :  { %v5504_v18 = vpop.f32.mrb[36].mxu1 }
 0x1f7   :  { %v5506_v20 = vpop.f32.mrb[37].mxu1  ;;  %1940 = vmatpush1.bf16.msra.mxu1 %v4527_v15 }
 0x1f8   :  { %v5508_v25 = vpop.f32.mrb[38].mxu1  ;;  %1941 = vmatprep.subr.bf16.mxu1 %v4532_v33 }
 0x1f9   :  { %v5510_v26 = vpop.f32.mrb[39].mxu1 }
 0x1fa   :  { %v5518_v28 = vpop.f32.mrb[40].mxu1 }
 0x1fb   :  { %v5520_v29 = vpop.f32.mrb[41].mxu1  ;;  %1942 = vmatpush1.bf16.msra.mxu1 %v4530_v31 }
 0x1fc   :  { %v5522_v22 = vpop.f32.mrb[42].mxu1  ;;  %1943 = vmatprep.subr.bf16.mxu1 %v4535_v55 }
 0x1fd   :  { %v5524_v30 = vpop.f32.mrb[43].mxu1 }
 0x1ff   :  { %1944 = vmatpush1.bf16.msra.mxu1 %v4533_v47 }
 0x200   :  { %1945 = vmatprep.subr.bf16.mxu1 %v4538_v0 }
 0x203   :  { %1946 = vmatpush1.bf16.msra.mxu1 %v4536_v60 }
 0x204   :  { %1947 = vmatprep.subr.bf16.mxu1 %v4541_v32 }
 0x207   :  { %1948 = vmatpush1.bf16.msra.mxu1 %v4539_v42 }
 0x208   :  { %2096 = vmatprep.subr.bf16.mxu1 %v4544_v45 }
 0x20f   :  { %v5532_v35 = vpop.f32.mrb[44].mxu1 }
 0x210   :  { %v5534_v36 = vpop.f32.mrb[45].mxu1 }
 0x211   :  { %v5536_v37 = vpop.f32.mrb[46].mxu1 }
 0x212   :  { %v5538_v40 = vpop.f32.mrb[47].mxu1 }
 0x255   :  { %v1190_v58 = vpop.f32.mrb[8].mxu0 }
 0x256   :  { %v4074_v59 = vadd.f32 %v5409_v34, %v1190_v58  ;;  %v1192_v8 = vpop.f32.mrb[9].mxu0 }
 0x257   :  { %v4075_v10 = vadd.f32 %v5412_v49, %v1192_v8  ;;  %v1194_v15 = vpop.f32.mrb[10].mxu0  ;;  %v5571_v49 = vld [vmem:[%s6126_s2] ss:$0 sm:$0xff] }
 0x258   :  { %v4076_v27 = vadd.f32 %v5414_v57, %v1194_v15  ;;  %v1196_v31 = vpop.f32.mrb[11].mxu0 }
 0x259   :  { %v4077_v33 = vadd.f32 %v5416_v61, %v1196_v31 }
 0x25a   :  { %v1737_v47 = vmax.f32 %v4074_v59, %v4076_v27 }
 0x25b   :  { %v1738_v55 = vmax.f32 %v4075_v10, %v4077_v33 }
 0x25d   :  { %v1763_v60 = vmax.f32 %v1737_v47, %v1738_v55  ;;  %v1200_v0 = vpop.f32.mrb[12].mxu0 }
 0x25e   :  { %v4078_v42 = vadd.f32 %v5419_v2, %v1200_v0  ;;  %v1202_v32 = vpop.f32.mrb[13].mxu0 }
 0x25f   :  { %v4079_v1 = vadd.f32 %v5421_v5, %v1202_v32  ;;  %v1204_v34 = vpop.f32.mrb[14].mxu0  ;;  %v1784_v8 = vadd.f32 %v5571_v49, %v1763_v60 }
 0x260   :  { %v4080_v45 = vadd.f32 %v5423_v6, %v1204_v34  ;;  %v1206_v58 = vpop.f32.mrb[15].mxu0 }
 0x261   :  { %v4081_v57 = vadd.f32 %v5425_v7, %v1206_v58  ;;  %4686 = vtanh.f32 %v1784_v8 }
 0x262   :  { %v1739_v61 = vmax.f32 %v4078_v42, %v4080_v45 }
 0x263   :  { %v1740_v59 = vmax.f32 %v4079_v1, %v4081_v57 }
 0x265   :  { %v1764_v10 = vmax.f32 %v1739_v61, %v1740_v59  ;;  %v1210_v2 = vpop.f32.mrb[16].mxu0 }
 0x266   :  { %v4082_v15 = vadd.f32 %v5429_v9, %v1210_v2  ;;  %v1212_v5 = vpop.f32.mrb[17].mxu0 }
 0x267   :  { %v1785_v27 = vadd.f32 %v5571_v49, %v1764_v10  ;;  %v4083_v6 = vadd.f32 %v5431_v12, %v1212_v5  ;;  %v1214_v31 = vpop.f32.mrb[18].mxu0 }
 0x268   :  { %v4084_v33 = vadd.f32 %v5433_v16, %v1214_v31  ;;  %v1216_v47 = vpop.f32.mrb[19].mxu0 }
 0x269   :  { %4688 = vtanh.f32 %v1785_v27  ;;  %v4085_v7 = vadd.f32 %v5435_v19, %v1216_v47 }
 0x26a   :  { %v1741_v1 = vmax.f32 %v4082_v15, %v4084_v33 }
 0x26b   :  { %v1742_v55 = vmax.f32 %v4083_v6, %v4085_v7  ;;  %v5585_v57 = vpop.eup %4686 }
 0x26d   :  { %v1765_v60 = vmax.f32 %v1741_v1, %v1742_v55  ;;  %v1220_v0 = vpop.f32.mrb[20].mxu0 }
 0x26e   :  { %v4086_v42 = vadd.f32 %v5438_v21, %v1220_v0  ;;  %v1222_v9 = vpop.f32.mrb[21].mxu0 }
 0x26f   :  { %v1786_v32 = vadd.f32 %v5571_v49, %v1765_v60  ;;  %v4087_v34 = vadd.f32 %v5440_v24, %v1222_v9  ;;  %v1224_v12 = vpop.f32.mrb[22].mxu0 }
 0x270   :  { %v4088_v45 = vadd.f32 %v5442_v38, %v1224_v12  ;;  %v1226_v58 = vpop.f32.mrb[23].mxu0 }
 0x271   :  { %4690 = vtanh.f32 %v1786_v32  ;;  %v4089_v16 = vadd.f32 %v5444_v39, %v1226_v58 }
 0x272   :  { %v1743_v19 = vmax.f32 %v4086_v42, %v4088_v45 }
 0x273   :  { %v4689_v61 = vpop.eup %4688  ;;  %v1744_v59 = vmax.f32 %v4087_v34, %v4089_v16 }
 0x274   :  { %v5588_v8 = vpack.c.bf16 %v4689_v61, %v5585_v57 }
 0x275   :  { %v1766_v21 = vmax.f32 %v1743_v19, %v1744_v59  ;;  %v1230_v10 = vpop.f32.mrb[24].mxu0 }
 0x276   :  { %v4090_v2 = vadd.f32 %v5446_v23, %v1230_v10  ;;  %v1232_v24 = vpop.f32.mrb[25].mxu0 }
 0x277   :  { %v1787_v15 = vadd.f32 %v5571_v49, %v1766_v21  ;;  %v4091_v38 = vadd.f32 %v5448_v41, %v1232_v24  ;;  %v1234_v5 = vpop.f32.mrb[26].mxu0 }
 0x278   :  { %v4092_v39 = vadd.f32 %v5450_v43, %v1234_v5  ;;  %v1236_v27 = vpop.f32.mrb[27].mxu0 }
 0x279   :  { %4692 = vtanh.f32 %v1787_v15  ;;  %v4093_v6 = vadd.f32 %v5452_v44, %v1236_v27 }
 0x27a   :  { %v1745_v31 = vmax.f32 %v4090_v2, %v4092_v39 }
 0x27b   :  { %v4691_v33 = vpop.eup %4690  ;;  %v1746_v47 = vmax.f32 %v4091_v38, %v4093_v6 }
 0x27c   :  { %v5595_v7 = vpack.c.bf16 %v4691_v33, %v4689_v61 }
 0x27d   :  { %v1767_v1 = vmax.f32 %v1745_v31, %v1746_v47  ;;  %v1240_v55 = vpop.f32.mrb[28].mxu0 }
 0x27e   :  { %v4094_v23 = vadd.f32 %v5460_v46, %v1240_v55  ;;  %v1242_v60 = vpop.f32.mrb[29].mxu0 }
 0x27f   :  { %v1788_v0 = vadd.f32 %v5571_v49, %v1767_v1  ;;  %v4095_v41 = vadd.f32 %v5462_v48, %v1242_v60  ;;  %v1244_v42 = vpop.f32.mrb[30].mxu0 }
 0x280   :  { %v4096_v43 = vadd.f32 %v5464_v50, %v1244_v42  ;;  %v1246_v9 = vpop.f32.mrb[31].mxu0 }
 0x281   :  { %4694 = vtanh.f32 %v1788_v0  ;;  %v4097_v44 = vadd.f32 %v5466_v51, %v1246_v9 }
 0x282   :  { %v1747_v32 = vmax.f32 %v4094_v23, %v4096_v43 }
 0x283   :  { %v4693_v34 = vpop.eup %4692  ;;  %v1748_v12 = vmax.f32 %v4095_v41, %v4097_v44 }
 0x284   :  { %v5602_v45 = vpack.c.bf16 %v4693_v34, %v4691_v33 }
 0x285   :  { %v1768_v58 = vmax.f32 %v1747_v32, %v1748_v12  ;;  %v1250_v16 = vpop.f32.mrb[32].mxu0 }
 0x286   :  { %v4098_v46 = vadd.f32 %v5468_v52, %v1250_v16  ;;  %v1252_v19 = vpop.f32.mrb[33].mxu0 }
 0x287   :  { %v1789_v61 = vadd.f32 %v5571_v49, %v1768_v58  ;;  %v4099_v48 = vadd.f32 %v5470_v53, %v1252_v19  ;;  %v1254_v59 = vpop.f32.mrb[34].mxu0 }
 0x288   :  { %v4100_v50 = vadd.f32 %v5472_v54, %v1254_v59  ;;  %v1256_v21 = vpop.f32.mrb[35].mxu0 }
 0x289   :  { %4696 = vtanh.f32 %v1789_v61  ;;  %v4101_v51 = vadd.f32 %v5474_v56, %v1256_v21 }
 0x28a   :  { %v1749_v10 = vmax.f32 %v4098_v46, %v4100_v50 }
 0x28b   :  { %v4695_v2 = vpop.eup %4694  ;;  %v1750_v24 = vmax.f32 %v4099_v48, %v4101_v51 }
 0x28c   :  { %v5609_v15 = vpack.c.bf16 %v4695_v2, %v4693_v34 }
 0x28d   :  { %v1769_v38 = vmax.f32 %v1749_v10, %v1750_v24  ;;  %v1260_v5 = vpop.f32.mrb[36].mxu0 }
 0x28e   :  { %v4102_v52 = vadd.f32 %v5482_v62, %v1260_v5  ;;  %v1262_v39 = vpop.f32.mrb[37].mxu0 }
 0x28f   :  { %v1790_v27 = vadd.f32 %v5571_v49, %v1769_v38  ;;  %v4103_v53 = vadd.f32 %v5484_v63, %v1262_v39  ;;  %v1264_v6 = vpop.f32.mrb[38].mxu0 }
 0x290   :  { %v4104_v54 = vadd.f32 %v5486_v3, %v1264_v6  ;;  %v1266_v31 = vpop.f32.mrb[39].mxu0 }
 0x291   :  { %4698 = vtanh.f32 %v1790_v27  ;;  %v4105_v56 = vadd.f32 %v5488_v4, %v1266_v31 }
 0x292   :  { %v1751_v33 = vmax.f32 %v4102_v52, %v4104_v54 }
 0x293   :  { %v4697_v47 = vpop.eup %4696  ;;  %v1752_v1 = vmax.f32 %v4103_v53, %v4105_v56 }
 0x294   :  { %v5616_v55 = vpack.c.bf16 %v4697_v47, %v4695_v2 }
 0x295   :  { %v1770_v23 = vmax.f32 %v1751_v33, %v1752_v1  ;;  %v1270_v60 = vpop.f32.mrb[40].mxu0 }
 0x296   :  { %v4106_v62 = vadd.f32 %v5496_v11, %v1270_v60  ;;  %v1272_v0 = vpop.f32.mrb[41].mxu0 }
 0x297   :  { %v1791_v41 = vadd.f32 %v5571_v49, %v1770_v23  ;;  %v4107_v63 = vadd.f32 %v5498_v13, %v1272_v0  ;;  %v1274_v42 = vpop.f32.mrb[42].mxu0 }
 0x298   :  { %v4108_v3 = vadd.f32 %v5500_v14, %v1274_v42  ;;  %v1276_v43 = vpop.f32.mrb[43].mxu0 }
 0x299   :  { %4700 = vtanh.f32 %v1791_v41  ;;  %v4109_v4 = vadd.f32 %v5502_v17, %v1276_v43 }
 0x29a   :  { %v1753_v9 = vmax.f32 %v4106_v62, %v4108_v3 }
 0x29b   :  { %v4699_v44 = vpop.eup %4698  ;;  %v1754_v32 = vmax.f32 %v4107_v63, %v4109_v4 }
 0x29c   :  { %v5623_v34 = vpack.c.bf16 %v4699_v44, %v4697_v47 }
 0x29d   :  { %v1771_v12 = vmax.f32 %v1753_v9, %v1754_v32  ;;  %v1280_v58 = vpop.f32.mrb[44].mxu0 }
 0x29e   :  { %v4110_v11 = vadd.f32 %v5504_v18, %v1280_v58  ;;  %v1282_v16 = vpop.f32.mrb[45].mxu0 }
 0x29f   :  { %v1792_v46 = vadd.f32 %v5571_v49, %v1771_v12  ;;  %v4111_v13 = vadd.f32 %v5506_v20, %v1282_v16  ;;  %v1284_v19 = vpop.f32.mrb[46].mxu0 }
 0x2a0   :  { %v4112_v14 = vadd.f32 %v5508_v25, %v1284_v19  ;;  %v1286_v61 = vpop.f32.mrb[47].mxu0 }
 0x2a1   :  { %4702 = vtanh.f32 %v1792_v46  ;;  %v4113_v17 = vadd.f32 %v5510_v26, %v1286_v61 }
 0x2a2   :  { %v1755_v48 = vmax.f32 %v4110_v11, %v4112_v14 }
 0x2a3   :  { %v4701_v59 = vpop.eup %4700  ;;  %v1756_v50 = vmax.f32 %v4111_v13, %v4113_v17 }
 0x2a4   :  { %v5630_v21 = vpack.c.bf16 %v4701_v59, %v4699_v44 }
 0x2a5   :  { %v1772_v51 = vmax.f32 %v1755_v48, %v1756_v50  ;;  %v1290_v10 = vpop.f32.mrb[48].mxu0  ;;  %v4542_v48 = vld [vmem:[%s6125_s3] ss:$8 sps:$4 sm:$0xff]   ;;  %v4547_v50 = vld [vmem:[%s6125_s3 + $0x14] ss:$8 sps:$4 sm:$0xff]  }
 0x2a6   :  { %v4114_v18 = vadd.f32 %v5518_v28, %v1290_v10  ;;  %v1292_v2 = vpop.f32.mrb[49].mxu0  ;;  %v6135_v10 = vmov 0  }
 0x2a7   :  { %v1793_v24 = vadd.f32 %v5571_v49, %v1772_v51  ;;  %v4115_v20 = vadd.f32 %v5520_v29, %v1292_v2  ;;  %v1294_v38 = vpop.f32.mrb[50].mxu0  ;;  %v4553_v2 = vld [vmem:[%s6125_s3 + $0x34] ss:$8 sps:$4 sm:$0xff]  }
 0x2a8   :  { %v4116_v25 = vadd.f32 %v5522_v22, %v1294_v38  ;;  %v1296_v5 = vpop.f32.mrb[51].mxu0  ;;  %v4554_v38 = vld [vmem:[%s6125_s3 + $0x40] ss:$8 sps:$4 sm:$0xff]  }
 0x2a9   :  { %4704 = vtanh.f32 %v1793_v24  ;;  %v4117_v26 = vadd.f32 %v5524_v30, %v1296_v5  ;;  %v4551_v24 = vld [vmem:[%s6125_s3 + $0x30] ss:$8 sps:$4 sm:$0xff]  }
 0x2aa   :  { %v1757_v52 = vmax.f32 %v4114_v18, %v4116_v25  ;;  %v4550_v18 = vld [vmem:[%s6125_s3 + $0x24] ss:$8 sps:$4 sm:$0xff]   ;;  %v4559_v25 = vld [vmem:[%s6125_s3 + $0x54] ss:$8 sps:$4 sm:$0xff]   ;;  %v4557_v5 = vld [vmem:[%s6125_s3 + $0x50] ss:$8 sps:$4 sm:$0xff]  }
 0x2ab   :  { %v4703_v39 = vpop.eup %4702  ;;  %v1758_v27 = vmax.f32 %v4115_v20, %v4117_v26  ;;  %v4556_v20 = vld [vmem:[%s6125_s3 + $0x44] ss:$8 sps:$4 sm:$0xff]  }
 0x2ac   :  { %v5637_v53 = vpack.c.bf16 %v4703_v39, %v4701_v59  ;;  %v4562_v26 = vld [vmem:[%s6125_s3 + $0x64] ss:$8 sps:$4 sm:$0xff]  }
 0x2ad   :  { %v1773_v6 = vmax.f32 %v1757_v52, %v1758_v27  ;;  %v1300_v54 = vpop.f32.mrb[52].mxu0  ;;  %v4560_v52 = vld [vmem:[%s6125_s3 + $0x60] ss:$8 sps:$4 sm:$0xff]   ;;  %v4563_v27 = vld [vmem:[%s6125_s3 + $0x70] ss:$8 sps:$4 sm:$0xff]  }
 0x2ae   :  { %v4118_v28 = vadd.f32 %v5532_v35, %v1300_v54  ;;  %v1302_v31 = vpop.f32.mrb[53].mxu0  ;;  %v4566_v54 = vld [vmem:[%s6125_s3 + $0x100] ss:$8 sps:$4 sm:$0xff]  }
 0x2af   :  { %v1794_v56 = vadd.f32 %v5571_v49, %v1773_v6  ;;  %v4119_v29 = vadd.f32 %v5534_v36, %v1302_v31  ;;  %v1304_v33 = vpop.f32.mrb[54].mxu0  ;;  %v4568_v6 = vld [vmem:[%s6125_s3 + $0x104] ss:$8 sps:$4 sm:$0xff]   ;;  %v4569_v31 = vld [vmem:[%s6125_s3 + $0x110] ss:$8 sps:$4 sm:$0xff]  }
 0x2b0   :  { %v4120_v22 = vadd.f32 %v5536_v37, %v1304_v33  ;;  %v1306_v47 = vpop.f32.mrb[55].mxu0  ;;  %v4577_v33 = vld [vmem:[%s6125_s3 + $0x134] ss:$8 sps:$4 sm:$0xff]  }
 0x2b1   :  { %4706 = vtanh.f32 %v1794_v56  ;;  %v4121_v30 = vadd.f32 %v5538_v40, %v1306_v47  ;;  %v4574_v56 = vld [vmem:[%s6125_s3 + $0x124] ss:$8 sps:$4 sm:$0xff]  }
 0x2b2   :  { %v1759_v1 = vmax.f32 %v4118_v28, %v4120_v22  ;;  %v4571_v28 = vld [vmem:[%s6125_s3 + $0x114] ss:$8 sps:$4 sm:$0xff]   ;;  %v4575_v22 = vld [vmem:[%s6125_s3 + $0x130] ss:$8 sps:$4 sm:$0xff]   ;;  %v4580_v47 = vld [vmem:[%s6125_s3 + $0x144] ss:$8 sps:$4 sm:$0xff]  }
 0x2b3   :  { %v5644_v23 = vpop.eup %4704  ;;  %v1760_v60 = vmax.f32 %v4119_v29, %v4121_v30  ;;  %v4572_v29 = vld [vmem:[%s6125_s3 + $0x120] ss:$8 sps:$4 sm:$0xff]  }
 0x2b4   :  { %v5647_v62 = vpack.c.bf16 %v5644_v23, %v4703_v39  ;;  %v4565_v39 = vld [vmem:[%s6125_s3 + $0x74] ss:$8 sps:$4 sm:$0xff]   ;;  %v4578_v30 = vld [vmem:[%s6125_s3 + $0x140] ss:$8 sps:$4 sm:$0xff]  }
 0x2b5   :  { %v1774_v35 = vmax.f32 %v1759_v1, %v1760_v60  ;;  %v1538_v0 = vpop.f32.mrb[0].mxu0  ;;  %v4583_v1 = vld [vmem:[%s6125_s3 + $0x154] ss:$8 sps:$4 sm:$0xff]   ;;  %v4581_v60 = vld [vmem:[%s6125_s3 + $0x150] ss:$8 sps:$4 sm:$0xff]  }
 0x2b6   :  { %v1540_v41 = vpop.f32.mrb[1].mxu0 }
 0x2b7   :  { %v1795_v63 = vadd.f32 %v5571_v49, %v1774_v35  ;;  %v1542_v36 = vpop.f32.mrb[2].mxu0  ;;  %v4586_v35 = vld [vmem:[%s6125_s3 + $0x164] ss:$8 sps:$4 sm:$0xff]  }
 0x2b8   :  { %v1733_v42 = vmax.f32 %v1538_v0, %v1542_v36  ;;  %v1544_v3 = vpop.f32.mrb[3].mxu0  ;;  %v4584_v0 = vld [vmem:[%s6125_s3 + $0x160] ss:$8 sps:$4 sm:$0xff]   ;;  %v4592_v36 = vld [vmem:[%s6125_s3 + $0x184] ss:$8 sps:$4 sm:$0xff]  }
 0x2b9   :  { %4708 = vtanh.f32 %v1795_v63  ;;  %v1734_v37 = vmax.f32 %v1540_v41, %v1544_v3  ;;  %v4589_v41 = vld [vmem:[%s6125_s3 + $0x174] ss:$8 sps:$4 sm:$0xff]   ;;  %v4587_v63 = vld [vmem:[%s6125_s3 + $0x170] ss:$8 sps:$4 sm:$0xff]  }
 0x2ba   :  { %v4595_v3 = vld [vmem:[%s6125_s3 + $0x194] ss:$8 sps:$4 sm:$0xff]  }
 0x2bb   :  { %v5650_v43 = vpop.eup %4706  ;;  %v1761_v40 = vmax.f32 %v1733_v42, %v1734_v37  ;;  %v4590_v42 = vld [vmem:[%s6125_s3 + $0x180] ss:$8 sps:$4 sm:$0xff]   ;;  %v4593_v37 = vld [vmem:[%s6125_s3 + $0x190] ss:$8 sps:$4 sm:$0xff]  }
 0x2bc   :  { %v2380_v4 = vpack.c.bf16 %v5650_v43, %v5644_v23  ;;  %v4640_v23 = vld [vmem:[%s6127_s5 + $0x10] sm:$0xff]  }
 0x2bd   :  { %v1548_v9 = vpop.f32.mrb[4].mxu0  ;;  %v1782_v16 = vadd.f32 %v5571_v49, %v1761_v40  ;;  %v4598_v40 = vld [vmem:[%s6125_s3 + $0x1a4] ss:$8 sps:$4 sm:$0xff]  }
 0x2be   :  { %v1550_v44 = vpop.f32.mrb[5].mxu0 }
 0x2bf   :  { %v1552_v32 = vpop.f32.mrb[6].mxu0  ;;  %4710 = vtanh.f32 %v1782_v16  ;;  %v4610_v16 = vld [vmem:[%s6125_s3 + $0x1e4] ss:$8 sps:$4 sm:$0xff]  }
 0x2c0   :  { %v1735_v12 = vmax.f32 %v1548_v9, %v1552_v32  ;;  %v1554_v58 = vpop.f32.mrb[7].mxu0  ;;  %v4596_v9 = vld [vmem:[%s6125_s3 + $0x1a0] ss:$8 sps:$4 sm:$0xff]   ;;  %v4604_v32 = vld [vmem:[%s6125_s3 + $0x1c4] ss:$8 sps:$4 sm:$0xff]  }
 0x2c1   :  { %v1736_v11 = vmax.f32 %v1550_v44, %v1554_v58  ;;  %v4601_v44 = vld [vmem:[%s6125_s3 + $0x1b4] ss:$8 sps:$4 sm:$0xff]  }
 0x2c2   :  { %v4607_v58 = vld [vmem:[%s6125_s3 + $0x1d4] ss:$8 sps:$4 sm:$0xff]  }
 0x2c3   :  { %v5655_v46 = vpop.eup %4708  ;;  %v1762_v13 = vmax.f32 %v1735_v12, %v1736_v11  ;;  %v4602_v12 = vld [vmem:[%s6125_s3 + $0x1c0] ss:$8 sps:$4 sm:$0xff]   ;;  %v4605_v11 = vld [vmem:[%s6125_s3 + $0x1d0] ss:$8 sps:$4 sm:$0xff]  }
 0x2c4   :  { %v2581_v19 = vpack.c.bf16 %v5655_v46, %v5650_v43  ;;  %v4645_v43 = vld [vmem:[%s6127_s5 + $0x38] sm:$0xff]  }
 0x2c5   :  { %v1783_v14 = vadd.f32 %v5571_v49, %v1762_v13  ;;  %v4545_v49 = vld [vmem:[%s6125_s3 + $0x10] ss:$8 sps:$4 sm:$0xff]   ;;  %v4608_v13 = vld [vmem:[%s6125_s3 + $0x1e0] ss:$8 sps:$4 sm:$0xff]  }
 0x2c7   :  { %4712 = vtanh.f32 %v1783_v14  ;;  %v4613_v14 = vld [vmem:[%s6125_s3 + $0x1f4] ss:$8 sps:$4 sm:$0xff]  }
 0x2c9   :  { %v4711_v61 = vpop.eup %4710 }
 0x2d1   :  { %v4713_v17 = vpop.eup %4712 }
 0x2d2   :  { %v1831_v59 = vpack.c.bf16 %v5585_v57, %v4713_v17  ;;  %v1810_v51 = vpack.c.bf16 %v4713_v17, %v4711_v61  ;;  %v4548_v57 = vld [vmem:[%s6125_s3 + $0x20] ss:$8 sps:$4 sm:$0xff]   ;;  %v4611_v61 = vld [vmem:[%s6125_s3 + $0x1f0] ss:$8 sps:$4 sm:$0xff]   ;;  %v4616_v17 = vld [vmem:[%s6125_s3 + $0x204] ss:$8 sps:$4 sm:$0xff]  }
 0x2d4   :  { %1966 = vmatmul.mubr.bf16.vlgmr.msra.gmra.mrb[48].mxu1 %v1831_v59  ;;  %v4619_v59 = vld [vmem:[%s6125_s3 + $0x214] ss:$8 sps:$4 sm:$0xff]  }
 0x2d5   :  { %2097 = vmatpush1.bf16.msra.mxu1 %v4542_v48  ;;  %1975 = vmatprep.mubr.bf16.mxu1 %v6135_v10  ;;  %v4614_v48 = vld [vmem:[%s6125_s3 + $0x200] ss:$8 sps:$4 sm:$0xff]  }
 0x2d6   :  { %2098 = vmatprep.subr.bf16.mxu1 %v4547_v50  ;;  %v4617_v50 = vld [vmem:[%s6125_s3 + $0x210] ss:$8 sps:$4 sm:$0xff]  }
 0x2d9   :  { %2099 = vmatpush1.bf16.msra.mxu1 %v4545_v49  ;;  %v4620_v49 = vld [vmem:[%s6125_s3 + $0x220] ss:$8 sps:$4 sm:$0xff]  }
 0x2da   :  { %2100 = vmatprep.subr.bf16.mxu1 %v4550_v18  ;;  %v4623_v18 = vld [vmem:[%s6125_s3 + $0x230] ss:$8 sps:$4 sm:$0xff]  }
 0x2dc   :  { %1976 = vmatmul.mubr.bf16.gmra.mrb[52].mxu1 %v5595_v7 }
 0x2dd   :  { %2101 = vmatpush1.bf16.msra.mxu1 %v4548_v57  ;;  %1985 = vmatprep.mubr.bf16.mxu1 %v6135_v10  ;;  %v4628_v57 = vld [vmem:[%s6125_s3 + $0x244] ss:$8 sps:$4 sm:$0xff]  }
 0x2de   :  { %2102 = vmatprep.subr.bf16.mxu1 %v4553_v2  ;;  %v4626_v2 = vld [vmem:[%s6125_s3 + $0x240] ss:$8 sps:$4 sm:$0xff]  }
 0x2e1   :  { %2103 = vmatpush1.bf16.msra.mxu1 %v4551_v24  ;;  %v4629_v24 = vld [vmem:[%s6125_s3 + $0x250] ss:$8 sps:$4 sm:$0xff]  }
 0x2e2   :  { %2104 = vmatprep.subr.bf16.mxu1 %v4556_v20  ;;  %v4634_v20 = vld [vmem:[%s6125_s3 + $0x264] ss:$8 sps:$4 sm:$0xff]  }
 0x2e4   :  { %1986 = vmatmul.mubr.bf16.gmra.mrb[56].mxu1 %v5609_v15 }
 0x2e5   :  { %2105 = vmatpush1.bf16.msra.mxu1 %v4554_v38  ;;  %1995 = vmatprep.mubr.bf16.mxu1 %v6135_v10  ;;  %v4632_v38 = vld [vmem:[%s6125_s3 + $0x260] ss:$8 sps:$4 sm:$0xff]  }
 0x2e6   :  { %2106 = vmatprep.subr.bf16.mxu1 %v4559_v25  ;;  %v4635_v25 = vld [vmem:[%s6125_s3 + $0x270] ss:$8 sps:$4 sm:$0xff]  }
 0x2e9   :  { %2107 = vmatpush1.bf16.msra.mxu1 %v4557_v5  ;;  %v4731_v5 = vmov 0.0  }
 0x2ea   :  { %2108 = vmatprep.subr.bf16.mxu1 %v4562_v26  ;;  %v4639_v26 = vld [vmem:[%s6127_s5 + $0x8] sm:$0xff]  }
 0x2ec   :  { %1996 = vmatmul.mubr.bf16.gmra.mrb[60].mxu1 %v5623_v34 }
 0x2ed   :  { %2005 = vmatprep.mubr.bf16.mxu1 %v6135_v10  ;;  %2109 = vmatpush1.bf16.msra.mxu1 %v4560_v52 }
 0x2ee   :  { %2110 = vmatprep.subr.bf16.mxu1 %v4565_v39 }
 0x2f1   :  { %2111 = vmatpush1.bf16.msra.mxu1 %v4563_v27  ;;  %v3769_v27 = vld [vmem:[%s6128_s4] ss:$0 sm:$0xff] }
 0x2f2   :  { %2277 = vmatprep.subr.bf16.mxu1 %v4568_v6 }
 0x2f4   :  { %2006 = vmatmul.mubr.bf16.gmra.mrb[64].mxu1 %v5637_v53 }
 0x2f5   :  { %2128 = vmatprep.mubr.bf16.mxu1 %v6135_v10 }
 0x2fc   :  { %2129 = vmatmul.mubr.bf16.vlgmr.msra.gmra.mrb[48].mxu1 %v1810_v51  ;;  %v4622_v51 = vld [vmem:[%s6125_s3 + $0x224] ss:$8 sps:$4 sm:$0xff]  }
 0x2fd   :  { %2278 = vmatpush1.bf16.msra.mxu1 %v4566_v54  ;;  %2138 = vmatprep.mubr.bf16.mxu1 %v6135_v10 }
 0x2fe   :  { %2279 = vmatprep.subr.bf16.mxu1 %v4571_v28 }
 0x301   :  { %2280 = vmatpush1.bf16.msra.mxu1 %v4569_v31 }
 0x302   :  { %2281 = vmatprep.subr.bf16.mxu1 %v4574_v56 }
 0x304   :  { %2139 = vmatmul.mubr.bf16.gmra.mrb[52].mxu1 %v5588_v8 }
 0x305   :  { %2282 = vmatpush1.bf16.msra.mxu1 %v4572_v29  ;;  %2148 = vmatprep.mubr.bf16.mxu1 %v6135_v10 }
 0x306   :  { %2283 = vmatprep.subr.bf16.mxu1 %v4577_v33 }
 0x309   :  { %2284 = vmatpush1.bf16.msra.mxu1 %v4575_v22 }
 0x30a   :  { %2285 = vmatprep.subr.bf16.mxu1 %v4580_v47 }
 0x30c   :  { %2149 = vmatmul.mubr.bf16.gmra.mrb[56].mxu1 %v5602_v45 }
 0x30d   :  { %2286 = vmatpush1.bf16.msra.mxu1 %v4578_v30  ;;  %2158 = vmatprep.mubr.bf16.mxu1 %v6135_v10 }
 0x30e   :  { %2287 = vmatprep.subr.bf16.mxu1 %v4583_v1 }
 0x311   :  { %2288 = vmatpush1.bf16.msra.mxu1 %v4581_v60 }
 0x312   :  { %2289 = vmatprep.subr.bf16.mxu1 %v4586_v35 }
 0x314   :  { %2159 = vmatmul.mubr.bf16.gmra.mrb[60].mxu1 %v5616_v55 }
 0x315   :  { %2168 = vmatprep.mubr.bf16.mxu1 %v6135_v10  ;;  %2290 = vmatpush1.bf16.msra.mxu1 %v4584_v0 }
 0x316   :  { %2291 = vmatprep.subr.bf16.mxu1 %v4589_v41 }
 0x319   :  { %2292 = vmatpush1.bf16.msra.mxu1 %v4587_v63 }
 0x31a   :  { %2478 = vmatprep.subr.bf16.mxu1 %v4592_v36  ;;  %v4646_v36 = vld [vmem:[%s6127_s5 + $0x40] sm:$0xff]  }
 0x31c   :  { %2169 = vmatmul.mubr.bf16.gmra.mrb[64].mxu1 %v5630_v21 }
 0x31d   :  { %2309 = vmatprep.mubr.bf16.mxu1 %v6135_v10 }
 0x324   :  { %2310 = vmatmul.mubr.bf16.vlgmr.msra.gmra.mrb[48].mxu1 %v5588_v8  ;;  %v4599_v8 = vld [vmem:[%s6125_s3 + $0x1b0] ss:$8 sps:$4 sm:$0xff]  }
 0x325   :  { %2479 = vmatpush1.bf16.msra.mxu1 %v4590_v42  ;;  %2319 = vmatprep.mubr.bf16.mxu1 %v6135_v10 }
 0x326   :  { %2480 = vmatprep.subr.bf16.mxu1 %v4595_v3 }
 0x329   :  { %2481 = vmatpush1.bf16.msra.mxu1 %v4593_v37 }
 0x32a   :  { %2482 = vmatprep.subr.bf16.mxu1 %v4598_v40 }
 0x32c   :  { %2320 = vmatmul.mubr.bf16.gmra.mrb[52].mxu1 %v5602_v45 }
 0x32d   :  { %2483 = vmatpush1.bf16.msra.mxu1 %v4596_v9  ;;  %2329 = vmatprep.mubr.bf16.mxu1 %v6135_v10  ;;  %v4647_v9 = vld [vmem:[%s6127_s5 + $0x48] sm:$0xff]  }
 0x32e   :  { %2484 = vmatprep.subr.bf16.mxu1 %v4601_v44 }
 0x331   :  { %2485 = vmatpush1.bf16.msra.mxu1 %v4599_v8 }
 0x332   :  { %2486 = vmatprep.subr.bf16.mxu1 %v4604_v32 }
 0x334   :  { %2330 = vmatmul.mubr.bf16.gmra.mrb[56].mxu1 %v5616_v55 }
 0x335   :  { %2487 = vmatpush1.bf16.msra.mxu1 %v4602_v12  ;;  %2339 = vmatprep.mubr.bf16.mxu1 %v6135_v10 }
 0x336   :  { %2488 = vmatprep.subr.bf16.mxu1 %v4607_v58  ;;  %v4648_v58 = vld [vmem:[%s6127_s5 + $0x50] sm:$0xff]  }
 0x339   :  { %2489 = vmatpush1.bf16.msra.mxu1 %v4605_v11 }
 0x33a   :  { %2490 = vmatprep.subr.bf16.mxu1 %v4610_v16 }
 0x33c   :  { %2340 = vmatmul.mubr.bf16.gmra.mrb[60].mxu1 %v5630_v21 }
 0x33d   :  { %2349 = vmatprep.mubr.bf16.mxu1 %v6135_v10  ;;  %2491 = vmatpush1.bf16.msra.mxu1 %v4608_v13 }
 0x33e   :  { %2492 = vmatprep.subr.bf16.mxu1 %v4613_v14 }
 0x341   :  { %2493 = vmatpush1.bf16.msra.mxu1 %v4611_v61  ;;  %v4649_v61 = vld [vmem:[%s6127_s5 + $0x58] sm:$0xff]  }
 0x342   :  { %2679 = vmatprep.subr.bf16.mxu1 %v4616_v17 }
 0x344   :  { %2350 = vmatmul.mubr.bf16.gmra.mrb[64].mxu1 %v5647_v62 }
 0x345   :  { %2510 = vmatprep.mubr.bf16.mxu1 %v6135_v10 }
 0x34c   :  { %2511 = vmatmul.mubr.bf16.vlgmr.msra.gmra.mrb[48].mxu1 %v5595_v7  ;;  %v4625_v7 = vld [vmem:[%s6125_s3 + $0x234] ss:$8 sps:$4 sm:$0xff]  }
 0x34d   :  { %2680 = vmatpush1.bf16.msra.mxu1 %v4614_v48  ;;  %2520 = vmatprep.mubr.bf16.mxu1 %v6135_v10 }
 0x34e   :  { %2681 = vmatprep.subr.bf16.mxu1 %v4619_v59 }
 0x351   :  { %2682 = vmatpush1.bf16.msra.mxu1 %v4617_v50 }
 0x352   :  { %2683 = vmatprep.subr.bf16.mxu1 %v4622_v51 }
 0x354   :  { %2521 = vmatmul.mubr.bf16.gmra.mrb[52].mxu1 %v5609_v15  ;;  %v4631_v15 = vld [vmem:[%s6125_s3 + $0x254] ss:$8 sps:$4 sm:$0xff]  }
 0x355   :  { %2684 = vmatpush1.bf16.msra.mxu1 %v4620_v49  ;;  %2530 = vmatprep.mubr.bf16.mxu1 %v6135_v10 }
 0x356   :  { %2685 = vmatprep.subr.bf16.mxu1 %v4625_v7  ;;  %v4650_v7 = vld [vmem:[%s6127_s5 + $0x60] sm:$0xff]  }
 0x359   :  { %2686 = vmatpush1.bf16.msra.mxu1 %v4623_v18 }
 0x35a   :  { %2687 = vmatprep.subr.bf16.mxu1 %v4628_v57 }
 0x35c   :  { %2531 = vmatmul.mubr.bf16.gmra.mrb[56].mxu1 %v5623_v34  ;;  %v4637_v34 = vld [vmem:[%s6125_s3 + $0x274] ss:$8 sps:$4 sm:$0xff]  }
 0x35d   :  { %2688 = vmatpush1.bf16.msra.mxu1 %v4626_v2  ;;  %2540 = vmatprep.mubr.bf16.mxu1 %v6135_v10  ;;  %v4651_v2 = vld [vmem:[%s6127_s5 + $0x68] sm:$0xff]  }
 0x35e   :  { %2689 = vmatprep.subr.bf16.mxu1 %v4631_v15  ;;  %v4652_v15 = vld [vmem:[%s6127_s5 + $0x70] sm:$0xff]  }
 0x361   :  { %2690 = vmatpush1.bf16.msra.mxu1 %v4629_v24  ;;  %v4653_v24 = vld [vmem:[%s6127_s5 + $0x78] sm:$0xff]  }
 0x362   :  { %2691 = vmatprep.subr.bf16.mxu1 %v4634_v20 }
 0x364   :  { %2541 = vmatmul.mubr.bf16.gmra.mrb[60].mxu1 %v5637_v53  ;;  %v4638_v53 = vld [vmem:[%s6127_s5] sm:$0xff]  }
 0x365   :  { %2550 = vmatprep.mubr.bf16.mxu1 %v6135_v10  ;;  %2692 = vmatpush1.bf16.msra.mxu1 %v4632_v38  ;;  %v4654_v38 = vld [vmem:[%s6127_s5 + $0x80] sm:$0xff]  }
 0x366   :  { %2693 = vmatprep.subr.bf16.mxu1 %v4637_v34 }
 0x369   :  { %2694 = vmatpush1.bf16.msra.mxu1 %v4635_v25  ;;  %v4655_v25 = vld [vmem:[%s6127_s5 + $0x88] sm:$0xff]  }
 0x36a   :  { %3938 = vmatprep.subr.bf16.mxu1 %v4731_v5 }
 0x36c   :  { %2551 = vmatmul.mubr.bf16.gmra.mrb[64].mxu1 %v2380_v4 }
 0x36d   :  { %2711 = vmatprep.mubr.bf16.mxu1 %v6135_v10 }
 0x374   :  { %2712 = vmatmul.mubr.bf16.vlgmr.msra.gmra.mrb[48].mxu1 %v5602_v45  ;;  %v4641_v45 = vld [vmem:[%s6127_s5 + $0x18] sm:$0xff]  }
 0x375   :  { %2721 = vmatprep.mubr.bf16.mxu1 %v6135_v10  ;;  %3939 = vmatpush3.bf16.msra.mxu1 %v4638_v53  ;;  %v4656_v53 = vld [vmem:[%s6127_s5 + $0x90] sm:$0xff]  }
 0x376   :  { %3940 = vmatprep.subr.bf16.mxu1 %v4731_v5 }
 0x379   :  { %3941 = vmatpush3.bf16.msra.mxu1 %v4639_v26  ;;  %v4657_v26 = vld [vmem:[%s6127_s5 + $0x98] sm:$0xff]  }
 0x37a   :  { %3942 = vmatprep.subr.bf16.mxu1 %v4731_v5 }
 0x37c   :  { %2722 = vmatmul.mubr.bf16.gmra.mrb[52].mxu1 %v5616_v55  ;;  %v4642_v55 = vld [vmem:[%s6127_s5 + $0x20] sm:$0xff]  }
 0x37d   :  { %2731 = vmatprep.mubr.bf16.mxu1 %v6135_v10  ;;  %3943 = vmatpush3.bf16.msra.mxu1 %v4640_v23  ;;  %v4658_v23 = vld [vmem:[%s6127_s5 + $0xa0] sm:$0xff]  }
 0x37e   :  { %3944 = vmatprep.subr.bf16.mxu1 %v4731_v5 }
 0x381   :  { %3945 = vmatpush3.bf16.msra.mxu1 %v4641_v45  ;;  %v4659_v45 = vld [vmem:[%s6127_s5 + $0xa8] sm:$0xff]  }
 0x382   :  { %3946 = vmatprep.subr.bf16.mxu1 %v4731_v5 }
 0x384   :  { %2732 = vmatmul.mubr.bf16.gmra.mrb[56].mxu1 %v5630_v21  ;;  %v4643_v21 = vld [vmem:[%s6127_s5 + $0x28] sm:$0xff]  }
 0x385   :  { %2741 = vmatprep.mubr.bf16.mxu1 %v6135_v10  ;;  %3947 = vmatpush3.bf16.msra.mxu1 %v4642_v55  ;;  %v4660_v55 = vld [vmem:[%s6127_s5 + $0xb0] sm:$0xff]  }
 0x386   :  { %3948 = vmatprep.subr.bf16.mxu1 %v4731_v5 }
 0x389   :  { %3949 = vmatpush3.bf16.msra.mxu1 %v4643_v21  ;;  %v4661_v21 = vld [vmem:[%s6127_s5 + $0xb8] sm:$0xff]  }
 0x38a   :  { %3950 = vmatprep.subr.bf16.mxu1 %v4731_v5 }
 0x38c   :  { %2742 = vmatmul.mubr.bf16.gmra.mrb[60].mxu1 %v5647_v62  ;;  %v4644_v62 = vld [vmem:[%s6127_s5 + $0x30] sm:$0xff]  }
 0x38d   :  { %2751 = vmatprep.mubr.bf16.mxu1 %v6135_v10  ;;  %3951 = vmatpush3.bf16.msra.mxu1 %v4644_v62 }
 0x38e   :  { %3952 = vmatprep.subr.bf16.mxu1 %v4731_v5 }
 0x391   :  { %3953 = vmatpush3.bf16.msra.mxu1 %v4645_v43  ;;  %v4662_v43 = vld [vmem:[%s6127_s5 + $0xc0] sm:$0xff]  }
 0x392   :  { %3958 = vmatprep.subr.bf16.mxu1 %v4731_v5 }
 0x394   :  { %2752 = vmatmul.mubr.bf16.gmra.mrb[64].mxu1 %v2581_v19 }
 0x395   :  { %3954 = vmatprep.mubr.msk.bf16.mxu1 %vm4732_vm0, %v4731_v5 }
 0x447   :  { %v2713_v4 = vpop.f32.mrb[48].mxu1 }
 0x448   :  { %v2715_v46 = vpop.f32.mrb[49].mxu1 }
 0x449   :  { %v2717_v19 = vpop.f32.mrb[50].mxu1 }
 0x44a   :  { %v2782_v10 = vmax.f32 %v2713_v4, %v2717_v19  ;;  %v2719_v52 = vpop.f32.mrb[51].mxu1  ;;  %v4664_v19 = vld [vmem:[%s6127_s5 + $0xd0] sm:$0xff]  }
 0x44b   :  { %v2783_v39 = vmax.f32 %v2715_v46, %v2719_v52  ;;  %v4663_v46 = vld [vmem:[%s6127_s5 + $0xc8] sm:$0xff]   ;;  %v4666_v52 = vld [vmem:[%s6127_s5 + $0xe0] sm:$0xff]  }
 0x44d   :  { %v2792_v6 = vmax.f32 %v2782_v10, %v2783_v39  ;;  %v4665_v10 = vld [vmem:[%s6127_s5 + $0xd8] sm:$0xff]   ;;  %v4667_v39 = vld [vmem:[%s6127_s5 + $0xe8] sm:$0xff]  }
 0x44f   :  { %v2804_v54 = vadd.f32 %v3769_v27, %v2792_v6  ;;  %v2723_v28 = vpop.f32.mrb[52].mxu1  ;;  %v4669_v6 = vld [vmem:[%s6127_s5 + $0xf8] sm:$0xff]  }
 0x450   :  { %v2725_v31 = vpop.f32.mrb[53].mxu1 }
 0x451   :  { %4714 = vtanh.f32 %v2804_v54  ;;  %v2727_v56 = vpop.f32.mrb[54].mxu1 }
 0x452   :  { %v2784_v29 = vmax.f32 %v2723_v28, %v2727_v56  ;;  %v2729_v33 = vpop.f32.mrb[55].mxu1  ;;  %v4670_v28 = vld [vmem:[%s6127_s5 + $0x100] sm:$0xff]   ;;  %v4671_v56 = vld [vmem:[%s6127_s5 + $0x108] sm:$0xff]  }
 0x453   :  { %v2785_v22 = vmax.f32 %v2725_v31, %v2729_v33  ;;  %v4673_v33 = vld [vmem:[%s6127_s5 + $0x118] sm:$0xff]  }
 0x455   :  { %v2793_v47 = vmax.f32 %v2784_v29, %v2785_v22  ;;  %v4672_v29 = vld [vmem:[%s6127_s5 + $0x110] sm:$0xff]   ;;  %v4674_v22 = vld [vmem:[%s6127_s5 + $0x120] sm:$0xff]  }
 0x457   :  { %v2733_v30 = vpop.f32.mrb[56].mxu1  ;;  %v2805_v51 = vadd.f32 %v3769_v27, %v2793_v47  ;;  %v4675_v47 = vld [vmem:[%s6127_s5 + $0x128] sm:$0xff]  }
 0x458   :  { %v2735_v1 = vpop.f32.mrb[57].mxu1 }
 0x459   :  { %v2737_v60 = vpop.f32.mrb[58].mxu1  ;;  %4716 = vtanh.f32 %v2805_v51 }
 0x45a   :  { %v2786_v35 = vmax.f32 %v2733_v30, %v2737_v60  ;;  %v2739_v0 = vpop.f32.mrb[59].mxu1  ;;  %v4676_v30 = vld [vmem:[%s6127_s5 + $0x130] sm:$0xff]  }
 0x45b   :  { %v4715_v41 = vpop.eup %4714  ;;  %v2787_v63 = vmax.f32 %v2735_v1, %v2739_v0  ;;  %v4677_v1 = vld [vmem:[%s6127_s5 + $0x138] sm:$0xff]  }
 0x45c   :  { %v2822_v42 = vpack.c.bf16 %v4715_v41, %v4715_v41  ;;  %v4679_v41 = vld [vmem:[%s6129_s7 + $0x8] sm:$0xff]  }
 0x45d   :  { %v2794_v3 = vmax.f32 %v2786_v35, %v2787_v63  ;;  %v4678_v35 = vld [vmem:[%s6129_s7] sm:$0xff]   ;;  %v4680_v63 = vld [vmem:[%s6129_s7 + $0x10] sm:$0xff]  }
 0x45e   :  { %3955 = vmatmul.mubr.bf16.vlgmr.msra.gmra.mrb[68].mxu1 %v2822_v42  ;;  %v4682_v42 = vld [vmem:[%s6129_s7 + $0x20] sm:$0xff]  }
 0x45f   :  { %v2806_v37 = vadd.f32 %v3769_v27, %v2794_v3  ;;  %3959 = vmatpush3.bf16.msra.mxu1 %v4646_v36  ;;  %v2743_v40 = vpop.f32.mrb[60].mxu1  ;;  %3974 = vmatprep.mubr.msk.bf16.mxu1 %vm4732_vm0, %v4731_v5  ;;  %v4681_v36 = vld [vmem:[%s6129_s7 + $0x18] sm:$0xff]   ;;  %v4683_v3 = vld [vmem:[%s6129_s7 + $0x28] sm:$0xff]  }
 0x460   :  { %v2745_v44 = vpop.f32.mrb[61].mxu1  ;;  %3960 = vmatprep.subr.bf16.mxu1 %v4731_v5 }
 0x461   :  { %v2747_v8 = vpop.f32.mrb[62].mxu1  ;;  %4718 = vtanh.f32 %v2806_v37  ;;  %v4684_v37 = vld [vmem:[%s6129_s7 + $0x30] sm:$0xff]  }
 0x462   :  { %v2788_v32 = vmax.f32 %v2743_v40, %v2747_v8  ;;  %v2749_v12 = vpop.f32.mrb[63].mxu1  ;;  %v4685_v40 = vld [vmem:[%s6129_s7 + $0x38] sm:$0xff]  }
 0x463   :  { %v2789_v11 = vmax.f32 %v2745_v44, %v2749_v12  ;;  %3961 = vmatpush3.bf16.msra.mxu1 %v4647_v9  ;;  %v4717_v20 = vpop.eup %4716  ;;  %v3770_v9 = vld [vmem:[%s6130_s6] ss:$0 sm:$0xff] }
 0x464   :  { %3962 = vmatprep.subr.bf16.mxu1 %v4731_v5  ;;  %v2928_v34 = vpack.c.bf16 %v4717_v20, %v4717_v20 }
 0x465   :  { %v2795_v16 = vmax.f32 %v2788_v32, %v2789_v11 }
 0x467   :  { %v5952_v13 = vadd.f32 %v3769_v27, %v2795_v16  ;;  %3963 = vmatpush3.bf16.msra.mxu1 %v4648_v58  ;;  %v2753_v14 = vpop.f32.mrb[64].mxu1 }
 0x468   :  { %v2755_v17 = vpop.f32.mrb[65].mxu1  ;;  %3964 = vmatprep.subr.bf16.mxu1 %v4731_v5 }
 0x469   :  { %v2757_v48 = vpop.f32.mrb[66].mxu1  ;;  %4720 = vtanh.f32 %v5952_v13 }
 0x46a   :  { %v2790_v59 = vmax.f32 %v2753_v14, %v2757_v48  ;;  %v2759_v50 = vpop.f32.mrb[67].mxu1 }
 0x46b   :  { %v2791_v49 = vmax.f32 %v2755_v17, %v2759_v50  ;;  %3965 = vmatpush3.bf16.msra.mxu1 %v4649_v61  ;;  %v4719_v62 = vpop.eup %4718 }
 0x46c   :  { %3966 = vmatprep.subr.bf16.mxu1 %v4731_v5  ;;  %v3035_v4 = vpack.c.bf16 %v4719_v62, %v4719_v62 }
 0x46d   :  { %v2796_v18 = vmax.f32 %v2790_v59, %v2791_v49 }
 0x46f   :  { %v5962_v57 = vadd.f32 %v3769_v27, %v2796_v18  ;;  %3967 = vmatpush3.bf16.msra.mxu1 %v4650_v7  ;;  %v4668_v27 = vld [vmem:[%s6127_s5 + $0xf0] sm:$0xff]  }
 0x470   :  { %3968 = vmatprep.subr.bf16.mxu1 %v4731_v5 }
 0x471   :  { %4722 = vtanh.f32 %v5962_v57 }
 0x473   :  { %3969 = vmatpush3.bf16.msra.mxu1 %v4651_v2  ;;  %v4721_v54 = vpop.eup %4720 }
 0x474   :  { %3970 = vmatprep.subr.bf16.mxu1 %v4731_v5  ;;  %v3142_v31 = vpack.c.bf16 %v4721_v54, %v4721_v54 }
 0x477   :  { %3971 = vmatpush3.bf16.msra.mxu1 %v4652_v15 }
 0x478   :  { %3972 = vmatprep.subr.bf16.mxu1 %v4731_v5 }
 0x47b   :  { %3973 = vmatpush3.bf16.msra.mxu1 %v4653_v24  ;;  %v4723_v60 = vpop.eup %4722 }
 0x47c   :  { %3978 = vmatprep.subr.bf16.mxu1 %v4731_v5  ;;  %v3249_v0 = vpack.c.bf16 %v4723_v60, %v4723_v60 }
 0x47e   :  { %3975 = vmatmul.mubr.bf16.vlgmr.msra.gmra.mrb[68].mxu1 %v2928_v34 }
 0x47f   :  { %3979 = vmatpush3.bf16.msra.mxu1 %v4654_v38  ;;  %3994 = vmatprep.mubr.msk.bf16.mxu1 %vm4732_vm0, %v4731_v5 }
 0x480   :  { %3980 = vmatprep.subr.bf16.mxu1 %v4731_v5 }
 0x483   :  { %3981 = vmatpush3.bf16.msra.mxu1 %v4655_v25 }
 0x484   :  { %3982 = vmatprep.subr.bf16.mxu1 %v4731_v5 }
 0x487   :  { %3983 = vmatpush3.bf16.msra.mxu1 %v4656_v53 }
 0x488   :  { %3984 = vmatprep.subr.bf16.mxu1 %v4731_v5 }
 0x48b   :  { %3985 = vmatpush3.bf16.msra.mxu1 %v4657_v26 }
 0x48c   :  { %3986 = vmatprep.subr.bf16.mxu1 %v4731_v5 }
 0x48f   :  { %3987 = vmatpush3.bf16.msra.mxu1 %v4658_v23 }
 0x490   :  { %3988 = vmatprep.subr.bf16.mxu1 %v4731_v5 }
 0x493   :  { %3989 = vmatpush3.bf16.msra.mxu1 %v4659_v45 }
 0x494   :  { %3990 = vmatprep.subr.bf16.mxu1 %v4731_v5 }
 0x497   :  { %3991 = vmatpush3.bf16.msra.mxu1 %v4660_v55 }
 0x498   :  { %3992 = vmatprep.subr.bf16.mxu1 %v4731_v5 }
 0x49b   :  { %3993 = vmatpush3.bf16.msra.mxu1 %v4661_v21 }
 0x49c   :  { %3998 = vmatprep.subr.bf16.mxu1 %v4731_v5 }
 0x49e   :  { %3995 = vmatmul.mubr.bf16.vlgmr.msra.gmra.mrb[68].mxu1 %v3035_v4 }
 0x49f   :  { %3999 = vmatpush3.bf16.msra.mxu1 %v4662_v43  ;;  %4014 = vmatprep.mubr.msk.bf16.mxu1 %vm4732_vm0, %v4731_v5 }
 0x4a0   :  { %4000 = vmatprep.subr.bf16.mxu1 %v4731_v5 }
 0x4a3   :  { %4001 = vmatpush3.bf16.msra.mxu1 %v4663_v46 }
 0x4a4   :  { %4002 = vmatprep.subr.bf16.mxu1 %v4731_v5 }
 0x4a7   :  { %4003 = vmatpush3.bf16.msra.mxu1 %v4664_v19 }
 0x4a8   :  { %4004 = vmatprep.subr.bf16.mxu1 %v4731_v5 }
 0x4ab   :  { %4005 = vmatpush3.bf16.msra.mxu1 %v4665_v10 }
 0x4ac   :  { %4006 = vmatprep.subr.bf16.mxu1 %v4731_v5 }
 0x4af   :  { %4007 = vmatpush3.bf16.msra.mxu1 %v4666_v52 }
 0x4b0   :  { %4008 = vmatprep.subr.bf16.mxu1 %v4731_v5 }
 0x4b3   :  { %4009 = vmatpush3.bf16.msra.mxu1 %v4667_v39 }
 0x4b4   :  { %4010 = vmatprep.subr.bf16.mxu1 %v4731_v5 }
 0x4b7   :  { %4011 = vmatpush3.bf16.msra.mxu1 %v4668_v27 }
 0x4b8   :  { %4012 = vmatprep.subr.bf16.mxu1 %v4731_v5 }
 0x4bb   :  { %4013 = vmatpush3.bf16.msra.mxu1 %v4669_v6 }
 0x4bc   :  { %4018 = vmatprep.subr.bf16.mxu1 %v4731_v5 }
 0x4be   :  { %4015 = vmatmul.mubr.bf16.vlgmr.msra.gmra.mrb[68].mxu1 %v3142_v31 }
 0x4bf   :  { %4019 = vmatpush3.bf16.msra.mxu1 %v4670_v28  ;;  %4034 = vmatprep.mubr.msk.bf16.mxu1 %vm4732_vm0, %v4731_v5 }
 0x4c0   :  { %4020 = vmatprep.subr.bf16.mxu1 %v4731_v5 }
 0x4c3   :  { %4021 = vmatpush3.bf16.msra.mxu1 %v4671_v56 }
 0x4c4   :  { %4022 = vmatprep.subr.bf16.mxu1 %v4731_v5 }
 0x4c7   :  { %4023 = vmatpush3.bf16.msra.mxu1 %v4672_v29 }
 0x4c8   :  { %4024 = vmatprep.subr.bf16.mxu1 %v4731_v5 }
 0x4cb   :  { %4025 = vmatpush3.bf16.msra.mxu1 %v4673_v33 }
 0x4cc   :  { %4026 = vmatprep.subr.bf16.mxu1 %v4731_v5 }
 0x4cf   :  { %4027 = vmatpush3.bf16.msra.mxu1 %v4674_v22 }
 0x4d0   :  { %4028 = vmatprep.subr.bf16.mxu1 %v4731_v5 }
 0x4d3   :  { %4029 = vmatpush3.bf16.msra.mxu1 %v4675_v47 }
 0x4d4   :  { %4030 = vmatprep.subr.bf16.mxu1 %v4731_v5 }
 0x4d7   :  { %4031 = vmatpush3.bf16.msra.mxu1 %v4676_v30 }
 0x4d8   :  { %4032 = vmatprep.subr.bf16.mxu1 %v4731_v5 }
 0x4db   :  { %4033 = vmatpush3.bf16.msra.mxu1 %v4677_v1 }
 0x4dc   :  { %4038 = vmatprep.subr.bf16.mxu1 %v4731_v5 }
 0x4de   :  { %4035 = vmatmul.mubr.bf16.vlgmr.msra.gmra.mrb[68].mxu1 %v3249_v0 }
 0x4df   :  { %4039 = vmatpush3.bf16.msra.mxu1 %v4678_v35  ;;  %4054 = vmatprep.mubr.msk.bf16.mxu1 %vm4732_vm0, %v4731_v5 }
 0x4e0   :  { %4040 = vmatprep.subr.bf16.mxu1 %v4731_v5 }
 0x4e3   :  { %4041 = vmatpush3.bf16.msra.mxu1 %v4679_v41 }
 0x4e4   :  { %4042 = vmatprep.subr.bf16.mxu1 %v4731_v5 }
 0x4e7   :  { %4043 = vmatpush3.bf16.msra.mxu1 %v4680_v63 }
 0x4e8   :  { %4044 = vmatprep.subr.bf16.mxu1 %v4731_v5 }
 0x4eb   :  { %4045 = vmatpush3.bf16.msra.mxu1 %v4681_v36 }
 0x4ec   :  { %4046 = vmatprep.subr.bf16.mxu1 %v4731_v5 }
 0x4ef   :  { %4047 = vmatpush3.bf16.msra.mxu1 %v4682_v42 }
 0x4f0   :  { %4048 = vmatprep.subr.bf16.mxu1 %v4731_v5 }
 0x4f3   :  { %4049 = vmatpush3.bf16.msra.mxu1 %v4683_v3 }
 0x4f4   :  { %4050 = vmatprep.subr.bf16.mxu1 %v4731_v5 }
 0x4f7   :  { %4051 = vmatpush3.bf16.msra.mxu1 %v4684_v37 }
 0x4f8   :  { %4052 = vmatprep.subr.bf16.mxu1 %v4731_v5  ;;  %v3875_v5 = vld [vmem:[%s6131_s8] ss:$0 sm:$0xff] }
 0x4fb   :  { %4053 = vmatpush3.bf16.msra.mxu1 %v4685_v40 }
 0x5b1   :  { %v3349_v44 = vpop.f32.mrb[68].mxu1 }
 0x5b2   :  { %v4122_v8 = vadd.f32 %v3770_v9, %v3349_v44  ;;  %v4036_v32 = vpop.f32.mrb[69].mxu1 }
 0x5b3   :  { %v3352_v12 = vpop.f32.mrb[70].mxu1 }
 0x5b4   :  { %4724 = vtanh.f32 %v4122_v8  ;;  %v4037_v58 = vpop.f32.mrb[71].mxu1 }
 0x5be   :  { %v4725_v11 = vpop.eup %4724 }
 0x5bf   :  { %v3357_v16 = vpack.c.bf16 %v4725_v11, %v4725_v11 }
 0x5c1   :  { %4055 = vmatmul.mubr.bf16.vlgmr.msra.gmra.mrb[72].mxu1 %v3357_v16 }
 0x694   :  { %v3463_v13 = vpop.f32.mrb[72].mxu1 }
 0x695   :  { %v3464_v14 = vadd.f32 %v3875_v5, %v3463_v13  ;;  %v4056_v61 = vpop.f32.mrb[73].mxu1 }
 0x696   :  { %v3466_v17 = vpop.f32.mrb[74].mxu1 }
 0x697   :  { %v3469_v48 = vsub.f32 0.0, %v3464_v14  ;;  %v4057_v59 = vpop.f32.mrb[75].mxu1 }
 0x699   :  { %v3470_v50 = vmul.f32 1.442695, %v3469_v48 }
 0x69b   :  { %4726 = vpow2.f32 %v3470_v50 }
 0x6a5   :  { %v4727_v51 = vpop.eup %4726 }
 0x6a6   :  { %v3472_v49 = vadd.f32 1.0, %v4727_v51 }
 0x6a8   :  { %4728 = vrcp.f32 %v3472_v49 }
 0x6b2   :  { %v4729_v7 = vpop.eup %4728 }
 0x6b3   :  { %3475 = vst [vmem:[%s6132_s9] sm:$0xff] %v4729_v7 }

</bundles_post_ra>
